<compile_context>
chip_gen: v5e
topology: v5e:2x2
jax: 0.10.0
libtpu: 0.0.40
codegen_flags: <defaults>
</compile_context>

<pallas_src>
import functools
import math

import jax
import jax.numpy as jnp
from jax import lax
from jax.experimental import pallas as pl
from jax.experimental.pallas import tpu as pltpu


# ---------------------------------------------------------------------------
# helpers
# ---------------------------------------------------------------------------

_VMEM_LIMIT = 32 * 1024 * 1024   # safe on v5e (128 MiB), v6e (128 MiB), v7x (64 MiB)


def _cparams(dims):
    return pltpu.CompilerParams(dimension_semantics=dims, vmem_limit_bytes=_VMEM_LIMIT)


def _row_tile(m, max_tile=256):
    """Largest row-tile <= max_tile that divides m (multiple of 8), else full m."""
    if m <= max_tile:
        return m
    for t in range(max_tile, 7, -8):
        if m % t == 0:
            return t
    return m   # TODO(synk): masked last tile for ragged M


def _f_tile(f, max_tile=512):
    """F-chunk width for the FFN: lane-aligned (multiple of 128) divisor of F."""
    if f <= max_tile:
        return f
    for t in range(max_tile, 127, -128):
        if f % t == 0:
            return t
    return f


def _act(y, activation):
    if activation == "relu":
        return jnp.maximum(y, 0.0)
    if activation == "gelu":
        return jax.nn.gelu(y, approximate=False)   # matches torch F.gelu default
    return y


def _ln(t, g, b, eps):
    mu = jnp.mean(t, axis=-1, keepdims=True)
    var = jnp.mean((t - mu) ** 2, axis=-1, keepdims=True)
    return (t - mu) * lax.rsqrt(var + eps) * g + b


# ---------------------------------------------------------------------------
# Fused attention block kernel (LN + QKV proj + MHA + out-proj + residual)
# ---------------------------------------------------------------------------

def _attn_block_kernel(*refs, num_heads, head_dim, scale, pre_norm, has_pos, cross, eps,
                       approx_softmax):
    idx = 0
    x_ref = refs[idx]; idx += 1
    pos_ref = None
    if has_pos:
        pos_ref = refs[idx]; idx += 1
    feat_ref = None
    if cross:
        feat_ref = refs[idx]; idx += 1
    (wq_ref, bq_ref, wk_ref, bk_ref, wv_ref, bv_ref,
     wo_ref, bo_ref, g_ref, b_ref) = refs[idx:idx + 10]
    idx += 10
    o_ref = refs[idx]; idx += 1
    w_ref = refs[idx] if cross else None

    f32 = jnp.float32
    x = x_ref[0].astype(f32)                                   # (Lq, D)
    g = g_ref[...].astype(f32)
    beta = b_ref[...].astype(f32)

    # --- LayerNorm prologue (norm_first) -----------------------------------
    xn = _ln(x, g, beta, eps) if pre_norm else x

    q_in = xn + pos_ref[0].astype(f32) if has_pos else xn
    if cross:
        kv = feat_ref[0].astype(f32)                           # (Lk, D)
        k_in = kv
        v_in = kv
    else:
        k_in = q_in                                            # q = k = x (+pos)
        v_in = xn                                              # value = x (no pos)

    # --- projections (scale folded into q once) ----------------------------
    q = (jnp.dot(q_in, wq_ref[...], preferred_element_type=f32) + bq_ref[...]) * scale
    k = jnp.dot(k_in, wk_ref[...], preferred_element_type=f32) + bk_ref[...]
    v = jnp.dot(v_in, wv_ref[...], preferred_element_type=f32) + bv_ref[...]
    wo = wo_ref[...].astype(f32)

    # --- per-head attention; out-projection decomposed per head ------------
    acc = jnp.zeros((q.shape[0], wo.shape[1]), f32)            # (Lq, D)
    w_sum = None
    for h in range(num_heads):                                 # static unroll
        lo = h * head_dim
        qh = q[:, lo:lo + head_dim]
        kh = k[:, lo:lo + head_dim]
        vh = v[:, lo:lo + head_dim]
        s = lax.dot_general(qh, kh, (((1,), (1,)), ((), ())),
                            preferred_element_type=f32)        # (Lq, Lk) — no k.T
        s = s - jnp.max(s, axis=-1, keepdims=True)
        e = jnp.exp(s)
        denom = jnp.sum(e, axis=-1, keepdims=True)
        if approx_softmax:
            p = e * pl.reciprocal(denom, approx=True)          # EUP slot, output path only
        else:
            p = e / denom                                      # exact (weights are emitted)
        oh = jnp.dot(p, vh, preferred_element_type=f32)        # (Lq, hd)
        acc = acc + jnp.dot(oh, wo[lo:lo + head_dim, :], preferred_element_type=f32)
        if cross:
            w_sum = p if w_sum is None else w_sum + p

    # --- residual (+ LayerNorm epilogue for post-norm) ----------------------
    y = x + acc + bo_ref[...].astype(f32)
    if not pre_norm:
        y = _ln(y, g, beta, eps)
    o_ref[0] = y.astype(o_ref.dtype)
    if cross:
        w_ref[0] = (w_sum * (1.0 / num_heads)).astype(w_ref.dtype)


def attn_block(x, pos, feat, p, ln_p, *, num_heads, pre_norm, cross, eps=1e-5):
    """x:(B,Lq,D), pos:(B,Lq,D)|None, feat:(B,Lk,D)|None (cross).  One pallas_call."""
    B, Lq, D = x.shape
    hd = D // num_heads
    scale = 1.0 / math.sqrt(hd)
    has_pos = pos is not None

    def slab(L):
        return pl.BlockSpec((1, L, D), lambda b: (b, 0, 0))

    def full2(a):
        return pl.BlockSpec(a.shape, lambda b: (0, 0))

    in_specs = [slab(Lq)]
    args = [x]
    if has_pos:
        in_specs.append(slab(Lq)); args.append(pos)
    if cross:
        Lk = feat.shape[1]
        in_specs.append(slab(Lk)); args.append(feat)
    else:
        Lk = Lq
    for name in ("wq", "bq", "wk", "bk", "wv", "bv", "wo", "bo"):
        in_specs.append(full2(p[name])); args.append(p[name])
    for arr in (ln_p["g"], ln_p["b"]):
        in_specs.append(full2(arr)); args.append(arr)

    o_spec = slab(Lq)
    o_shape = jax.ShapeDtypeStruct((B, Lq, D), x.dtype)
    if cross:
        out_specs = (o_spec, pl.BlockSpec((1, Lq, Lk), lambda b: (b, 0, 0)))
        out_shape = (o_shape, jax.ShapeDtypeStruct((B, Lq, Lk), x.dtype))
    else:
        out_specs = o_spec
        out_shape = o_shape

    kernel = functools.partial(
        _attn_block_kernel, num_heads=num_heads, head_dim=hd, scale=scale,
        pre_norm=pre_norm, has_pos=has_pos, cross=cross, eps=eps,
        approx_softmax=not cross)

    return pl.pallas_call(
        kernel,
        grid=(B,),
        in_specs=in_specs,
        out_specs=out_specs,
        out_shape=out_shape,
        compiler_params=_cparams(("parallel",)),
    )(*args)


# ---------------------------------------------------------------------------
# Fused FFN block kernel (LN + linear1 + act + linear2 + residual), F-chunked
# ---------------------------------------------------------------------------

def _ffn_block_kernel(x_ref, w1_ref, b1_ref, w2_ref, b2_ref, g_ref, b_ref, o_ref, acc_ref, *,
                      activation, pre_norm, eps):
    j = pl.program_id(1)

    @pl.when(j == 0)
    def _():
        acc_ref[...] = jnp.zeros_like(acc_ref)

    f32 = jnp.float32
    x = x_ref[...].astype(f32)
    g = g_ref[...].astype(f32)
    beta = b_ref[...].astype(f32)

    xin = _ln(x, g, beta, eps) if pre_norm else x
    h = jnp.dot(xin, w1_ref[...], preferred_element_type=f32) + b1_ref[...]
    h = _act(h, activation)
    acc_ref[...] += jnp.dot(h, w2_ref[...], preferred_element_type=f32)

    @pl.when(j == pl.num_programs(1) - 1)
    def _():
        y = x + acc_ref[...] + b2_ref[...].astype(f32)
        if not pre_norm:
            y = _ln(y, g, beta, eps)
        o_ref[...] = y.astype(o_ref.dtype)


def ffn_block(x2, fp, ln_p, *, activation, pre_norm, eps=1e-5):
    M, D = x2.shape
    F = fp["w1"].shape[1]
    tm = _row_tile(M)
    tf = _f_tile(F)

    return pl.pallas_call(
        functools.partial(_ffn_block_kernel, activation=activation, pre_norm=pre_norm, eps=eps),
        grid=(M // tm, F // tf),
        in_specs=[pl.BlockSpec((tm, D), lambda i, j: (i, 0)),
                  pl.BlockSpec((D, tf), lambda i, j: (0, j)),
                  pl.BlockSpec((1, tf), lambda i, j: (0, j)),
                  pl.BlockSpec((tf, D), lambda i, j: (j, 0)),
                  pl.BlockSpec((1, D), lambda i, j: (0, 0)),
                  pl.BlockSpec((1, D), lambda i, j: (0, 0)),
                  pl.BlockSpec((1, D), lambda i, j: (0, 0))],
        out_specs=pl.BlockSpec((tm, D), lambda i, j: (i, 0)),
        out_shape=jax.ShapeDtypeStruct((M, D), x2.dtype),
        scratch_shapes=[pltpu.VMEM((tm, D), jnp.float32)],
        compiler_params=_cparams(("parallel", "arbitrary")),
    )(x2, fp["w1"], fp["b1"], fp["w2"], fp["b2"], ln_p["g"], ln_p["b"])


# ---------------------------------------------------------------------------
# TransformerDecoderLayer forward (3 pallas_calls per layer)
# ---------------------------------------------------------------------------

def transformer_decoder_layer(params, queries, features, query_position=None, *,
                              num_heads, activation, norm_first, keep_self_attn,
                              ln_eps=1e-5):
    B, Lq, D = queries.shape
    x = queries
    pos = query_position

    # norm_first=True  -> LN prologue inside the block, residual with un-normed x
    # norm_first=False -> block on raw x, LN epilogue applied to (x + block(x))
    if keep_self_attn:
        x = attn_block(x, pos, None, params["self_attn"], params["norm1"],
                       num_heads=num_heads, pre_norm=norm_first, cross=False, eps=ln_eps)

    x, attn_w = attn_block(x, pos, features, params["cross_attn"], params["norm2"],
                           num_heads=num_heads, pre_norm=norm_first, cross=True, eps=ln_eps)

    x2 = ffn_block(x.reshape(B * Lq, D), params["ffn"], params["norm3"],
                   activation=activation, pre_norm=norm_first, eps=ln_eps)
    return x2.reshape(B, Lq, D), attn_w


# ---------------------------------------------------------------------------
# Pure-JAX reference (PyTorch semantics) for correctness checking
# ---------------------------------------------------------------------------

def reference_forward(params, queries, features, query_position, *, num_heads, activation,
                      norm_first, keep_self_attn, eps=1e-5):
    def ln(x, p):
        mu = x.mean(-1, keepdims=True)
        var = ((x - mu) ** 2).mean(-1, keepdims=True)
        return (x - mu) / jnp.sqrt(var + eps) * p["g"] + p["b"]

    def mha(q_in, k_in, v_in, p):
        B, Lq, D = q_in.shape
        hd = D // num_heads
        q = q_in @ p["wq"] + p["bq"]
        k = k_in @ p["wk"] + p["bk"]
        v = v_in @ p["wv"] + p["bv"]
        split = lambda t: t.reshape(t.shape[0], t.shape[1], num_heads, hd).transpose(0, 2, 1, 3)
        qh, kh, vh = split(q), split(k), split(v)
        s = jnp.einsum("bhqd,bhkd->bhqk", qh, kh) / math.sqrt(hd)
        pw = jax.nn.softmax(s, axis=-1)
        o = jnp.einsum("bhqk,bhkd->bhqd", pw, vh)
        o = o.transpose(0, 2, 1, 3).reshape(B, Lq, D)
        return o @ p["wo"] + p["bo"], pw.mean(axis=1)

    act = (lambda t: jnp.maximum(t, 0.0)) if activation == "relu" else \
          (lambda t: jax.nn.gelu(t, approximate=False))

    def ffn(x):
        h = act(x @ params["ffn"]["w1"] + params["ffn"]["b1"])
        return h @ params["ffn"]["w2"] + params["ffn"]["b2"]

    x = queries
    pos = query_position
    wp = lambda t: t if pos is None else t + pos
    if norm_first:
        if keep_self_attn:
            xn = ln(x, params["norm1"])
            s, _ = mha(wp(xn), wp(xn), xn, params["self_attn"])
            x = x + s
        xn = ln(x, params["norm2"])
        o, w = mha(wp(xn), features, features, params["cross_attn"])
        x = x + o
        x = x + ffn(ln(x, params["norm3"]))
    else:
        if keep_self_attn:
            s, _ = mha(wp(x), wp(x), x, params["self_attn"])
            x = ln(x + s, params["norm1"])
        o, w = mha(wp(x), features, features, params["cross_attn"])
        x = ln(x + o, params["norm2"])
        x = ln(x + ffn(x), params["norm3"])
    return x, w


# ---------------------------------------------------------------------------
# Deterministic parameter init
# ---------------------------------------------------------------------------

def init_params(key, hidden_size, feedforward_size):
    D, F = hidden_size, feedforward_size
    ks = iter(jax.random.split(key, 24))

    def dense(din, dout):
        return jax.random.normal(next(ks), (din, dout), jnp.float32) / math.sqrt(din)

    def bias(dout):
        return jax.random.normal(next(ks), (1, dout), jnp.float32) * 0.02

    def attn():
        return {"wq": dense(D, D), "bq": bias(D),
                "wk": dense(D, D), "bk": bias(D),
                "wv": dense(D, D), "bv": bias(D),
                "wo": dense(D, D), "bo": bias(D)}

    ln_p = lambda: {"g": jnp.ones((1, D), jnp.float32), "b": jnp.zeros((1, D), jnp.float32)}

    return {"self_attn": attn(), "cross_attn": attn(),
            "norm1": ln_p(), "norm2": ln_p(), "norm3": ln_p(),
            "ffn": {"w1": dense(D, F), "b1": bias(F),
                    "w2": dense(F, D), "b2": bias(D)}}


# ---------------------------------------------------------------------------
# main
# ---------------------------------------------------------------------------

if __name__ == "__main__":
    B, Lq, Lk = 2, 8, 12
    hidden_size, num_heads, feedforward_size = 32, 4, 64
    activation = "relu"
    keep_self_attn = True

    key = jax.random.PRNGKey(0)
    k_q, k_f, k_p, k_w = jax.random.split(key, 4)
    queries = jax.random.normal(k_q, (B, Lq, hidden_size), jnp.float32)
    features = jax.random.normal(k_f, (B, Lk, hidden_size), jnp.float32)
    query_position = jax.random.normal(k_p, (B, Lq, hidden_size), jnp.float32)
    params = init_params(k_w, hidden_size, feedforward_size)

    for norm_first in (False, True):
        fwd = jax.jit(functools.partial(
            transformer_decoder_layer,
            num_heads=num_heads, activation=activation,
            norm_first=norm_first, keep_self_attn=keep_self_attn))

        out, attn_w = fwd(params, queries, features, query_position)
        out = jax.block_until_ready(out)
        attn_w = jax.block_until_ready(attn_w)

        ref_out, ref_w = reference_forward(
            params, queries, features, query_position,
            num_heads=num_heads, activation=activation,
            norm_first=norm_first, keep_self_attn=keep_self_attn)

        assert out.shape == (B, Lq, hidden_size)
        assert attn_w.shape == (B, Lq, Lk)
        assert jnp.all(jnp.isfinite(out)) and jnp.all(jnp.isfinite(attn_w))
        # exact softmax for the emitted weights: rows sum to 1 to float precision
        assert jnp.allclose(jnp.sum(attn_w, axis=-1), 1.0, atol=1e-4)
        assert jnp.allclose(attn_w, ref_w, rtol=1e-2, atol=1e-2)
        assert jnp.allclose(out, ref_out, rtol=1e-2, atol=1e-2), (
            norm_first, float(jnp.max(jnp.abs(out - ref_out))))

    print("KERNEL_OK")
</pallas_src>

<mosaic_0001>
module attributes {stable_mosaic.version = 11 : i64} {
  func.func @_attn_block_kernel(%arg0: i32, %arg1: memref<1x8x32xf32, #tpu.memory_space<vmem>>, %arg2: memref<1x8x32xf32, #tpu.memory_space<vmem>>, %arg3: memref<32x32xf32, #tpu.memory_space<vmem>>, %arg4: memref<1x32xf32, #tpu.memory_space<vmem>>, %arg5: memref<32x32xf32, #tpu.memory_space<vmem>>, %arg6: memref<1x32xf32, #tpu.memory_space<vmem>>, %arg7: memref<32x32xf32, #tpu.memory_space<vmem>>, %arg8: memref<1x32xf32, #tpu.memory_space<vmem>>, %arg9: memref<32x32xf32, #tpu.memory_space<vmem>>, %arg10: memref<1x32xf32, #tpu.memory_space<vmem>>, %arg11: memref<1x32xf32, #tpu.memory_space<vmem>>, %arg12: memref<1x32xf32, #tpu.memory_space<vmem>>, %arg13: memref<1x8x32xf32, #tpu.memory_space<vmem>>) attributes {dimension_semantics = [#tpu.dimension_semantics<parallel>], iteration_bounds = array<i64: 2>, scalar_prefetch = 0 : i64, scratch_operands = 0 : i64, tpu.core_type = #tpu.core_type<tc>, window_params = [{transform_indices = @transform_0, window_bounds = array<i64: 1, 8, 32>}, {transform_indices = @transform_1, window_bounds = array<i64: 1, 8, 32>}, {pipeline_mode = #tpu.pipeline_mode<synchronous>, transform_indices = @transform_2, window_bounds = array<i64: 32, 32>}, {pipeline_mode = #tpu.pipeline_mode<synchronous>, transform_indices = @transform_3, window_bounds = array<i64: 1, 32>}, {pipeline_mode = #tpu.pipeline_mode<synchronous>, transform_indices = @transform_4, window_bounds = array<i64: 32, 32>}, {pipeline_mode = #tpu.pipeline_mode<synchronous>, transform_indices = @transform_5, window_bounds = array<i64: 1, 32>}, {pipeline_mode = #tpu.pipeline_mode<synchronous>, transform_indices = @transform_6, window_bounds = array<i64: 32, 32>}, {pipeline_mode = #tpu.pipeline_mode<synchronous>, transform_indices = @transform_7, window_bounds = array<i64: 1, 32>}, {pipeline_mode = #tpu.pipeline_mode<synchronous>, transform_indices = @transform_8, window_bounds = array<i64: 32, 32>}, {pipeline_mode = #tpu.pipeline_mode<synchronous>, transform_indices = @transform_9, window_bounds = array<i64: 1, 32>}, {pipeline_mode = #tpu.pipeline_mode<synchronous>, transform_indices = @transform_10, window_bounds = array<i64: 1, 32>}, {pipeline_mode = #tpu.pipeline_mode<synchronous>, transform_indices = @transform_11, window_bounds = array<i64: 1, 32>}, {transform_indices = @transform_12, window_bounds = array<i64: 1, 8, 32>}]} {
    %c0 = arith.constant 0 : index
    %c0_0 = arith.constant 0 : index
    %c0_1 = arith.constant 0 : index
    %0 = vector.load %arg1[%c0, %c0_0, %c0_1] : memref<1x8x32xf32, #tpu.memory_space<vmem>>, vector<1x8x32xf32>
    %1 = vector.shape_cast %0 : vector<1x8x32xf32> to vector<8x32xf32>
    %c0_2 = arith.constant 0 : index
    %c0_3 = arith.constant 0 : index
    %2 = vector.load %arg11[%c0_2, %c0_3] : memref<1x32xf32, #tpu.memory_space<vmem>>, vector<1x32xf32>
    %c0_4 = arith.constant 0 : index
    %c0_5 = arith.constant 0 : index
    %3 = vector.load %arg12[%c0_4, %c0_5] : memref<1x32xf32, #tpu.memory_space<vmem>>, vector<1x32xf32>
    %c0_6 = arith.constant 0 : index
    %c0_7 = arith.constant 0 : index
    %c0_8 = arith.constant 0 : index
    %4 = vector.load %arg2[%c0_6, %c0_7, %c0_8] : memref<1x8x32xf32, #tpu.memory_space<vmem>>, vector<1x8x32xf32>
    %5 = vector.shape_cast %4 : vector<1x8x32xf32> to vector<8x32xf32>
    %6 = arith.addf %1, %5 : vector<8x32xf32>
    %c0_9 = arith.constant 0 : index
    %c0_10 = arith.constant 0 : index
    %7 = vector.load %arg3[%c0_9, %c0_10] : memref<32x32xf32, #tpu.memory_space<vmem>>, vector<32x32xf32>
    %cst = arith.constant dense<0.000000e+00> : vector<8x32xf32>
    %8 = tpu.matmul %6, %7, %cst {dimension_numbers = #tpu.dot_dimension_numbers<[1], [0], [0], [1], [0, 0, 1, 1], [], []>} : vector<8x32xf32>, vector<32x32xf32>, vector<8x32xf32> -> vector<8x32xf32>
    %c0_11 = arith.constant 0 : index
    %c0_12 = arith.constant 0 : index
    %9 = vector.load %arg4[%c0_11, %c0_12] : memref<1x32xf32, #tpu.memory_space<vmem>>, vector<1x32xf32>
    %10 = vector.broadcast %9 : vector<1x32xf32> to vector<8x32xf32>
    %11 = arith.addf %8, %10 : vector<8x32xf32>
    %cst_13 = arith.constant 0.353553385 : f32
    %12 = vector.broadcast %cst_13 : f32 to vector<8x32xf32>
    %13 = arith.mulf %11, %12 : vector<8x32xf32>
    %c0_14 = arith.constant 0 : index
    %c0_15 = arith.constant 0 : index
    %14 = vector.load %arg5[%c0_14, %c0_15] : memref<32x32xf32, #tpu.memory_space<vmem>>, vector<32x32xf32>
    %cst_16 = arith.constant dense<0.000000e+00> : vector<8x32xf32>
    %15 = tpu.matmul %6, %14, %cst_16 {dimension_numbers = #tpu.dot_dimension_numbers<[1], [0], [0], [1], [0, 0, 1, 1], [], []>} : vector<8x32xf32>, vector<32x32xf32>, vector<8x32xf32> -> vector<8x32xf32>
    %c0_17 = arith.constant 0 : index
    %c0_18 = arith.constant 0 : index
    %16 = vector.load %arg6[%c0_17, %c0_18] : memref<1x32xf32, #tpu.memory_space<vmem>>, vector<1x32xf32>
    %17 = vector.broadcast %16 : vector<1x32xf32> to vector<8x32xf32>
    %18 = arith.addf %15, %17 : vector<8x32xf32>
    %c0_19 = arith.constant 0 : index
    %c0_20 = arith.constant 0 : index
    %19 = vector.load %arg7[%c0_19, %c0_20] : memref<32x32xf32, #tpu.memory_space<vmem>>, vector<32x32xf32>
    %cst_21 = arith.constant dense<0.000000e+00> : vector<8x32xf32>
    %20 = tpu.matmul %1, %19, %cst_21 {dimension_numbers = #tpu.dot_dimension_numbers<[1], [0], [0], [1], [0, 0, 1, 1], [], []>} : vector<8x32xf32>, vector<32x32xf32>, vector<8x32xf32> -> vector<8x32xf32>
    %c0_22 = arith.constant 0 : index
    %c0_23 = arith.constant 0 : index
    %21 = vector.load %arg8[%c0_22, %c0_23] : memref<1x32xf32, #tpu.memory_space<vmem>>, vector<1x32xf32>
    %22 = vector.broadcast %21 : vector<1x32xf32> to vector<8x32xf32>
    %23 = arith.addf %20, %22 : vector<8x32xf32>
    %c0_24 = arith.constant 0 : index
    %c0_25 = arith.constant 0 : index
    %24 = vector.load %arg9[%c0_24, %c0_25] : memref<32x32xf32, #tpu.memory_space<vmem>>, vector<32x32xf32>
    %cst_26 = arith.constant 0.000000e+00 : f32
    %25 = vector.broadcast %cst_26 : f32 to vector<8x32xf32>
    %26 = vector.extract_strided_slice %13 {offsets = [0, 0], sizes = [8, 8], strides = [1, 1]} : vector<8x32xf32> to vector<8x8xf32>
    %27 = vector.extract_strided_slice %18 {offsets = [0, 0], sizes = [8, 8], strides = [1, 1]} : vector<8x32xf32> to vector<8x8xf32>
    %28 = vector.extract_strided_slice %23 {offsets = [0, 0], sizes = [8, 8], strides = [1, 1]} : vector<8x32xf32> to vector<8x8xf32>
    %cst_27 = arith.constant dense<0.000000e+00> : vector<8x8xf32>
    %29 = tpu.matmul %26, %27, %cst_27 {dimension_numbers = #tpu.dot_dimension_numbers<[1], [1], [0], [0], [0, 0, 1, 0], [], []>} : vector<8x8xf32>, vector<8x8xf32>, vector<8x8xf32> -> vector<8x8xf32>
    %cst_28 = arith.constant dense<0xFF800000> : vector<8xf32>
    %30 = vector.multi_reduction <maximumf>, %29, %cst_28 [1] : vector<8x8xf32> to vector<8xf32>
    %31 = vector.shape_cast %30 : vector<8xf32> to vector<8x1xf32>
    %32 = vector.broadcast %31 : vector<8x1xf32> to vector<8x8xf32>
    %33 = arith.subf %29, %32 : vector<8x8xf32>
    %34 = math.exp %33 : vector<8x8xf32>
    %cst_29 = arith.constant dense<0.000000e+00> : vector<8xf32>
    %35 = vector.multi_reduction <add>, %34, %cst_29 [1] : vector<8x8xf32> to vector<8xf32>
    %36 = vector.shape_cast %35 : vector<8xf32> to vector<8x1xf32>
    %37 = tpu.reciprocal %36 {approx = true} : vector<8x1xf32> -> vector<8x1xf32>
    %38 = vector.broadcast %37 : vector<8x1xf32> to vector<8x8xf32>
    %39 = arith.mulf %34, %38 : vector<8x8xf32>
    %cst_30 = arith.constant dense<0.000000e+00> : vector<8x8xf32>
    %40 = tpu.matmul %39, %28, %cst_30 {dimension_numbers = #tpu.dot_dimension_numbers<[1], [0], [0], [1], [0, 0, 1, 1], [], []>} : vector<8x8xf32>, vector<8x8xf32>, vector<8x8xf32> -> vector<8x8xf32>
    %41 = vector.extract_strided_slice %24 {offsets = [0, 0], sizes = [8, 32], strides = [1, 1]} : vector<32x32xf32> to vector<8x32xf32>
    %cst_31 = arith.constant dense<0.000000e+00> : vector<8x32xf32>
    %42 = tpu.matmul %40, %41, %cst_31 {dimension_numbers = #tpu.dot_dimension_numbers<[1], [0], [0], [1], [0, 0, 1, 1], [], []>} : vector<8x8xf32>, vector<8x32xf32>, vector<8x32xf32> -> vector<8x32xf32>
    %43 = arith.addf %25, %42 : vector<8x32xf32>
    %44 = vector.extract_strided_slice %13 {offsets = [0, 8], sizes = [8, 8], strides = [1, 1]} : vector<8x32xf32> to vector<8x8xf32>
    %45 = vector.extract_strided_slice %18 {offsets = [0, 8], sizes = [8, 8], strides = [1, 1]} : vector<8x32xf32> to vector<8x8xf32>
    %46 = vector.extract_strided_slice %23 {offsets = [0, 8], sizes = [8, 8], strides = [1, 1]} : vector<8x32xf32> to vector<8x8xf32>
    %cst_32 = arith.constant dense<0.000000e+00> : vector<8x8xf32>
    %47 = tpu.matmul %44, %45, %cst_32 {dimension_numbers = #tpu.dot_dimension_numbers<[1], [1], [0], [0], [0, 0, 1, 0], [], []>} : vector<8x8xf32>, vector<8x8xf32>, vector<8x8xf32> -> vector<8x8xf32>
    %cst_33 = arith.constant dense<0xFF800000> : vector<8xf32>
    %48 = vector.multi_reduction <maximumf>, %47, %cst_33 [1] : vector<8x8xf32> to vector<8xf32>
    %49 = vector.shape_cast %48 : vector<8xf32> to vector<8x1xf32>
    %50 = vector.broadcast %49 : vector<8x1xf32> to vector<8x8xf32>
    %51 = arith.subf %47, %50 : vector<8x8xf32>
    %52 = math.exp %51 : vector<8x8xf32>
    %cst_34 = arith.constant dense<0.000000e+00> : vector<8xf32>
    %53 = vector.multi_reduction <add>, %52, %cst_34 [1] : vector<8x8xf32> to vector<8xf32>
    %54 = vector.shape_cast %53 : vector<8xf32> to vector<8x1xf32>
    %55 = tpu.reciprocal %54 {approx = true} : vector<8x1xf32> -> vector<8x1xf32>
    %56 = vector.broadcast %55 : vector<8x1xf32> to vector<8x8xf32>
    %57 = arith.mulf %52, %56 : vector<8x8xf32>
    %cst_35 = arith.constant dense<0.000000e+00> : vector<8x8xf32>
    %58 = tpu.matmul %57, %46, %cst_35 {dimension_numbers = #tpu.dot_dimension_numbers<[1], [0], [0], [1], [0, 0, 1, 1], [], []>} : vector<8x8xf32>, vector<8x8xf32>, vector<8x8xf32> -> vector<8x8xf32>
    %59 = vector.extract_strided_slice %24 {offsets = [8, 0], sizes = [8, 32], strides = [1, 1]} : vector<32x32xf32> to vector<8x32xf32>
    %cst_36 = arith.constant dense<0.000000e+00> : vector<8x32xf32>
    %60 = tpu.matmul %58, %59, %cst_36 {dimension_numbers = #tpu.dot_dimension_numbers<[1], [0], [0], [1], [0, 0, 1, 1], [], []>} : vector<8x8xf32>, vector<8x32xf32>, vector<8x32xf32> -> vector<8x32xf32>
    %61 = arith.addf %43, %60 : vector<8x32xf32>
    %62 = vector.extract_strided_slice %13 {offsets = [0, 16], sizes = [8, 8], strides = [1, 1]} : vector<8x32xf32> to vector<8x8xf32>
    %63 = vector.extract_strided_slice %18 {offsets = [0, 16], sizes = [8, 8], strides = [1, 1]} : vector<8x32xf32> to vector<8x8xf32>
    %64 = vector.extract_strided_slice %23 {offsets = [0, 16], sizes = [8, 8], strides = [1, 1]} : vector<8x32xf32> to vector<8x8xf32>
    %cst_37 = arith.constant dense<0.000000e+00> : vector<8x8xf32>
    %65 = tpu.matmul %62, %63, %cst_37 {dimension_numbers = #tpu.dot_dimension_numbers<[1], [1], [0], [0], [0, 0, 1, 0], [], []>} : vector<8x8xf32>, vector<8x8xf32>, vector<8x8xf32> -> vector<8x8xf32>
    %cst_38 = arith.constant dense<0xFF800000> : vector<8xf32>
    %66 = vector.multi_reduction <maximumf>, %65, %cst_38 [1] : vector<8x8xf32> to vector<8xf32>
    %67 = vector.shape_cast %66 : vector<8xf32> to vector<8x1xf32>
    %68 = vector.broadcast %67 : vector<8x1xf32> to vector<8x8xf32>
    %69 = arith.subf %65, %68 : vector<8x8xf32>
    %70 = math.exp %69 : vector<8x8xf32>
    %cst_39 = arith.constant dense<0.000000e+00> : vector<8xf32>
    %71 = vector.multi_reduction <add>, %70, %cst_39 [1] : vector<8x8xf32> to vector<8xf32>
    %72 = vector.shape_cast %71 : vector<8xf32> to vector<8x1xf32>
    %73 = tpu.reciprocal %72 {approx = true} : vector<8x1xf32> -> vector<8x1xf32>
    %74 = vector.broadcast %73 : vector<8x1xf32> to vector<8x8xf32>
    %75 = arith.mulf %70, %74 : vector<8x8xf32>
    %cst_40 = arith.constant dense<0.000000e+00> : vector<8x8xf32>
    %76 = tpu.matmul %75, %64, %cst_40 {dimension_numbers = #tpu.dot_dimension_numbers<[1], [0], [0], [1], [0, 0, 1, 1], [], []>} : vector<8x8xf32>, vector<8x8xf32>, vector<8x8xf32> -> vector<8x8xf32>
    %77 = vector.extract_strided_slice %24 {offsets = [16, 0], sizes = [8, 32], strides = [1, 1]} : vector<32x32xf32> to vector<8x32xf32>
    %cst_41 = arith.constant dense<0.000000e+00> : vector<8x32xf32>
    %78 = tpu.matmul %76, %77, %cst_41 {dimension_numbers = #tpu.dot_dimension_numbers<[1], [0], [0], [1], [0, 0, 1, 1], [], []>} : vector<8x8xf32>, vector<8x32xf32>, vector<8x32xf32> -> vector<8x32xf32>
    %79 = arith.addf %61, %78 : vector<8x32xf32>
    %80 = vector.extract_strided_slice %13 {offsets = [0, 24], sizes = [8, 8], strides = [1, 1]} : vector<8x32xf32> to vector<8x8xf32>
    %81 = vector.extract_strided_slice %18 {offsets = [0, 24], sizes = [8, 8], strides = [1, 1]} : vector<8x32xf32> to vector<8x8xf32>
    %82 = vector.extract_strided_slice %23 {offsets = [0, 24], sizes = [8, 8], strides = [1, 1]} : vector<8x32xf32> to vector<8x8xf32>
    %cst_42 = arith.constant dense<0.000000e+00> : vector<8x8xf32>
    %83 = tpu.matmul %80, %81, %cst_42 {dimension_numbers = #tpu.dot_dimension_numbers<[1], [1], [0], [0], [0, 0, 1, 0], [], []>} : vector<8x8xf32>, vector<8x8xf32>, vector<8x8xf32> -> vector<8x8xf32>
    %cst_43 = arith.constant dense<0xFF800000> : vector<8xf32>
    %84 = vector.multi_reduction <maximumf>, %83, %cst_43 [1] : vector<8x8xf32> to vector<8xf32>
    %85 = vector.shape_cast %84 : vector<8xf32> to vector<8x1xf32>
    %86 = vector.broadcast %85 : vector<8x1xf32> to vector<8x8xf32>
    %87 = arith.subf %83, %86 : vector<8x8xf32>
    %88 = math.exp %87 : vector<8x8xf32>
    %cst_44 = arith.constant dense<0.000000e+00> : vector<8xf32>
    %89 = vector.multi_reduction <add>, %88, %cst_44 [1] : vector<8x8xf32> to vector<8xf32>
    %90 = vector.shape_cast %89 : vector<8xf32> to vector<8x1xf32>
    %91 = tpu.reciprocal %90 {approx = true} : vector<8x1xf32> -> vector<8x1xf32>
    %92 = vector.broadcast %91 : vector<8x1xf32> to vector<8x8xf32>
    %93 = arith.mulf %88, %92 : vector<8x8xf32>
    %cst_45 = arith.constant dense<0.000000e+00> : vector<8x8xf32>
    %94 = tpu.matmul %93, %82, %cst_45 {dimension_numbers = #tpu.dot_dimension_numbers<[1], [0], [0], [1], [0, 0, 1, 1], [], []>} : vector<8x8xf32>, vector<8x8xf32>, vector<8x8xf32> -> vector<8x8xf32>
    %95 = vector.extract_strided_slice %24 {offsets = [24, 0], sizes = [8, 32], strides = [1, 1]} : vector<32x32xf32> to vector<8x32xf32>
    %cst_46 = arith.constant dense<0.000000e+00> : vector<8x32xf32>
    %96 = tpu.matmul %94, %95, %cst_46 {dimension_numbers = #tpu.dot_dimension_numbers<[1], [0], [0], [1], [0, 0, 1, 1], [], []>} : vector<8x8xf32>, vector<8x32xf32>, vector<8x32xf32> -> vector<8x32xf32>
    %97 = arith.addf %79, %96 : vector<8x32xf32>
    %98 = arith.addf %1, %97 : vector<8x32xf32>
    %c0_47 = arith.constant 0 : index
    %c0_48 = arith.constant 0 : index
    %99 = vector.load %arg10[%c0_47, %c0_48] : memref<1x32xf32, #tpu.memory_space<vmem>>, vector<1x32xf32>
    %100 = vector.broadcast %99 : vector<1x32xf32> to vector<8x32xf32>
    %101 = arith.addf %98, %100 : vector<8x32xf32>
    %cst_49 = arith.constant dense<0.000000e+00> : vector<8xf32>
    %102 = vector.multi_reduction <add>, %101, %cst_49 [1] : vector<8x32xf32> to vector<8xf32>
    %103 = vector.shape_cast %102 : vector<8xf32> to vector<8x1xf32>
    %cst_50 = arith.constant 3.200000e+01 : f32
    %104 = vector.broadcast %cst_50 : f32 to vector<8x1xf32>
    %105 = arith.divf %103, %104 : vector<8x1xf32>
    %106 = vector.broadcast %105 : vector<8x1xf32> to vector<8x32xf32>
    %107 = arith.subf %101, %106 : vector<8x32xf32>
    %108 = arith.mulf %107, %107 : vector<8x32xf32>
    %cst_51 = arith.constant dense<0.000000e+00> : vector<8xf32>
    %109 = vector.multi_reduction <add>, %108, %cst_51 [1] : vector<8x32xf32> to vector<8xf32>
    %110 = vector.shape_cast %109 : vector<8xf32> to vector<8x1xf32>
    %cst_52 = arith.constant 3.200000e+01 : f32
    %111 = vector.broadcast %cst_52 : f32 to vector<8x1xf32>
    %112 = arith.divf %110, %111 : vector<8x1xf32>
    %113 = vector.broadcast %105 : vector<8x1xf32> to vector<8x32xf32>
    %114 = arith.subf %101, %113 : vector<8x32xf32>
    %cst_53 = arith.constant 9.99999974E-6 : f32
    %115 = vector.broadcast %cst_53 : f32 to vector<8x1xf32>
    %116 = arith.addf %112, %115 : vector<8x1xf32>
    %117 = math.rsqrt %116 : vector<8x1xf32>
    %118 = vector.broadcast %117 : vector<8x1xf32> to vector<8x32xf32>
    %119 = arith.mulf %114, %118 : vector<8x32xf32>
    %120 = vector.broadcast %2 : vector<1x32xf32> to vector<8x32xf32>
    %121 = arith.mulf %119, %120 : vector<8x32xf32>
    %122 = vector.broadcast %3 : vector<1x32xf32> to vector<8x32xf32>
    %123 = arith.addf %121, %122 : vector<8x32xf32>
    %c0_54 = arith.constant 0 : index
    %c0_55 = arith.constant 0 : index
    %c0_56 = arith.constant 0 : index
    %124 = vector.load %arg13[%c0_54, %c0_55, %c0_56] : memref<1x8x32xf32, #tpu.memory_space<vmem>>, vector<1x8x32xf32>
    %125 = vector.shape_cast %124 : vector<1x8x32xf32> to vector<8x32xf32>
    %126 = vector.shape_cast %123 : vector<8x32xf32> to vector<1x8x32xf32>
    tpu.vector_store %arg13[%c0_54, %c0_55, %c0_56], %126 {strides = array<i32>} : memref<1x8x32xf32, #tpu.memory_space<vmem>>, vector<1x8x32xf32>,
    return
  }
  func.func @transform_0(%arg0: i32) -> (i32, i32, i32) {
    %c0_i32 = arith.constant 0 : i32
    %c0_i32_0 = arith.constant 0 : i32
    %c0_i32_1 = arith.constant 0 : i32
    return %arg0, %c0_i32, %c0_i32_0 : i32, i32, i32
  }
  func.func @transform_1(%arg0: i32) -> (i32, i32, i32) {
    %c0_i32 = arith.constant 0 : i32
    %c0_i32_0 = arith.constant 0 : i32
    %c0_i32_1 = arith.constant 0 : i32
    return %arg0, %c0_i32, %c0_i32_0 : i32, i32, i32
  }
  func.func @transform_2(%arg0: i32) -> (i32, i32) {
    %c0_i32 = arith.constant 0 : i32
    %c0_i32_0 = arith.constant 0 : i32
    %c0_i32_1 = arith.constant 0 : i32
    return %c0_i32, %c0_i32_0 : i32, i32
  }
  func.func @transform_3(%arg0: i32) -> (i32, i32) {
    %c0_i32 = arith.constant 0 : i32
    %c0_i32_0 = arith.constant 0 : i32
    %c0_i32_1 = arith.constant 0 : i32
    return %c0_i32, %c0_i32_0 : i32, i32
  }
  func.func @transform_4(%arg0: i32) -> (i32, i32) {
    %c0_i32 = arith.constant 0 : i32
    %c0_i32_0 = arith.constant 0 : i32
    %c0_i32_1 = arith.constant 0 : i32
    return %c0_i32, %c0_i32_0 : i32, i32
  }
  func.func @transform_5(%arg0: i32) -> (i32, i32) {
    %c0_i32 = arith.constant 0 : i32
    %c0_i32_0 = arith.constant 0 : i32
    %c0_i32_1 = arith.constant 0 : i32
    return %c0_i32, %c0_i32_0 : i32, i32
  }
  func.func @transform_6(%arg0: i32) -> (i32, i32) {
    %c0_i32 = arith.constant 0 : i32
    %c0_i32_0 = arith.constant 0 : i32
    %c0_i32_1 = arith.constant 0 : i32
    return %c0_i32, %c0_i32_0 : i32, i32
  }
  func.func @transform_7(%arg0: i32) -> (i32, i32) {
    %c0_i32 = arith.constant 0 : i32
    %c0_i32_0 = arith.constant 0 : i32
    %c0_i32_1 = arith.constant 0 : i32
    return %c0_i32, %c0_i32_0 : i32, i32
  }
  func.func @transform_8(%arg0: i32) -> (i32, i32) {
    %c0_i32 = arith.constant 0 : i32
    %c0_i32_0 = arith.constant 0 : i32
    %c0_i32_1 = arith.constant 0 : i32
    return %c0_i32, %c0_i32_0 : i32, i32
  }
  func.func @transform_9(%arg0: i32) -> (i32, i32) {
    %c0_i32 = arith.constant 0 : i32
    %c0_i32_0 = arith.constant 0 : i32
    %c0_i32_1 = arith.constant 0 : i32
    return %c0_i32, %c0_i32_0 : i32, i32
  }
  func.func @transform_10(%arg0: i32) -> (i32, i32) {
    %c0_i32 = arith.constant 0 : i32
    %c0_i32_0 = arith.constant 0 : i32
    %c0_i32_1 = arith.constant 0 : i32
    return %c0_i32, %c0_i32_0 : i32, i32
  }
  func.func @transform_11(%arg0: i32) -> (i32, i32) {
    %c0_i32 = arith.constant 0 : i32
    %c0_i32_0 = arith.constant 0 : i32
    %c0_i32_1 = arith.constant 0 : i32
    return %c0_i32, %c0_i32_0 : i32, i32
  }
  func.func @transform_12(%arg0: i32) -> (i32, i32, i32) {
    %c0_i32 = arith.constant 0 : i32
    %c0_i32_0 = arith.constant 0 : i32
    %c0_i32_1 = arith.constant 0 : i32
    return %arg0, %c0_i32, %c0_i32_0 : i32, i32, i32
  }
}

module attributes {stable_mosaic.version = 11 : i64} {
  func.func @_attn_block_kernel(%arg0: i32, %arg1: memref<1x8x32xf32, #tpu.memory_space<vmem>>, %arg2: memref<1x8x32xf32, #tpu.memory_space<vmem>>, %arg3: memref<1x12x32xf32, #tpu.memory_space<vmem>>, %arg4: memref<32x32xf32, #tpu.memory_space<vmem>>, %arg5: memref<1x32xf32, #tpu.memory_space<vmem>>, %arg6: memref<32x32xf32, #tpu.memory_space<vmem>>, %arg7: memref<1x32xf32, #tpu.memory_space<vmem>>, %arg8: memref<32x32xf32, #tpu.memory_space<vmem>>, %arg9: memref<1x32xf32, #tpu.memory_space<vmem>>, %arg10: memref<32x32xf32, #tpu.memory_space<vmem>>, %arg11: memref<1x32xf32, #tpu.memory_space<vmem>>, %arg12: memref<1x32xf32, #tpu.memory_space<vmem>>, %arg13: memref<1x32xf32, #tpu.memory_space<vmem>>, %arg14: memref<1x8x32xf32, #tpu.memory_space<vmem>>, %arg15: memref<1x8x12xf32, #tpu.memory_space<vmem>>) attributes {dimension_semantics = [#tpu.dimension_semantics<parallel>], iteration_bounds = array<i64: 2>, scalar_prefetch = 0 : i64, scratch_operands = 0 : i64, tpu.core_type = #tpu.core_type<tc>, window_params = [{transform_indices = @transform_0, window_bounds = array<i64: 1, 8, 32>}, {transform_indices = @transform_1, window_bounds = array<i64: 1, 8, 32>}, {transform_indices = @transform_2, window_bounds = array<i64: 1, 12, 32>}, {pipeline_mode = #tpu.pipeline_mode<synchronous>, transform_indices = @transform_3, window_bounds = array<i64: 32, 32>}, {pipeline_mode = #tpu.pipeline_mode<synchronous>, transform_indices = @transform_4, window_bounds = array<i64: 1, 32>}, {pipeline_mode = #tpu.pipeline_mode<synchronous>, transform_indices = @transform_5, window_bounds = array<i64: 32, 32>}, {pipeline_mode = #tpu.pipeline_mode<synchronous>, transform_indices = @transform_6, window_bounds = array<i64: 1, 32>}, {pipeline_mode = #tpu.pipeline_mode<synchronous>, transform_indices = @transform_7, window_bounds = array<i64: 32, 32>}, {pipeline_mode = #tpu.pipeline_mode<synchronous>, transform_indices = @transform_8, window_bounds = array<i64: 1, 32>}, {pipeline_mode = #tpu.pipeline_mode<synchronous>, transform_indices = @transform_9, window_bounds = array<i64: 32, 32>}, {pipeline_mode = #tpu.pipeline_mode<synchronous>, transform_indices = @transform_10, window_bounds = array<i64: 1, 32>}, {pipeline_mode = #tpu.pipeline_mode<synchronous>, transform_indices = @transform_11, window_bounds = array<i64: 1, 32>}, {pipeline_mode = #tpu.pipeline_mode<synchronous>, transform_indices = @transform_12, window_bounds = array<i64: 1, 32>}, {transform_indices = @transform_13, window_bounds = array<i64: 1, 8, 32>}, {transform_indices = @transform_14, window_bounds = array<i64: 1, 8, 12>}]} {
    %c0 = arith.constant 0 : index
    %c0_0 = arith.constant 0 : index
    %c0_1 = arith.constant 0 : index
    %0 = vector.load %arg1[%c0, %c0_0, %c0_1] : memref<1x8x32xf32, #tpu.memory_space<vmem>>, vector<1x8x32xf32>
    %1 = vector.shape_cast %0 : vector<1x8x32xf32> to vector<8x32xf32>
    %c0_2 = arith.constant 0 : index
    %c0_3 = arith.constant 0 : index
    %2 = vector.load %arg12[%c0_2, %c0_3] : memref<1x32xf32, #tpu.memory_space<vmem>>, vector<1x32xf32>
    %c0_4 = arith.constant 0 : index
    %c0_5 = arith.constant 0 : index
    %3 = vector.load %arg13[%c0_4, %c0_5] : memref<1x32xf32, #tpu.memory_space<vmem>>, vector<1x32xf32>
    %c0_6 = arith.constant 0 : index
    %c0_7 = arith.constant 0 : index
    %c0_8 = arith.constant 0 : index
    %4 = vector.load %arg2[%c0_6, %c0_7, %c0_8] : memref<1x8x32xf32, #tpu.memory_space<vmem>>, vector<1x8x32xf32>
    %5 = vector.shape_cast %4 : vector<1x8x32xf32> to vector<8x32xf32>
    %6 = arith.addf %1, %5 : vector<8x32xf32>
    %c0_9 = arith.constant 0 : index
    %c0_10 = arith.constant 0 : index
    %c0_11 = arith.constant 0 : index
    %7 = vector.load %arg3[%c0_9, %c0_10, %c0_11] : memref<1x12x32xf32, #tpu.memory_space<vmem>>, vector<1x12x32xf32>
    %8 = vector.shape_cast %7 : vector<1x12x32xf32> to vector<12x32xf32>
    %c0_12 = arith.constant 0 : index
    %c0_13 = arith.constant 0 : index
    %9 = vector.load %arg4[%c0_12, %c0_13] : memref<32x32xf32, #tpu.memory_space<vmem>>, vector<32x32xf32>
    %cst = arith.constant dense<0.000000e+00> : vector<8x32xf32>
    %10 = tpu.matmul %6, %9, %cst {dimension_numbers = #tpu.dot_dimension_numbers<[1], [0], [0], [1], [0, 0, 1, 1], [], []>} : vector<8x32xf32>, vector<32x32xf32>, vector<8x32xf32> -> vector<8x32xf32>
    %c0_14 = arith.constant 0 : index
    %c0_15 = arith.constant 0 : index
    %11 = vector.load %arg5[%c0_14, %c0_15] : memref<1x32xf32, #tpu.memory_space<vmem>>, vector<1x32xf32>
    %12 = vector.broadcast %11 : vector<1x32xf32> to vector<8x32xf32>
    %13 = arith.addf %10, %12 : vector<8x32xf32>
    %cst_16 = arith.constant 0.353553385 : f32
    %14 = vector.broadcast %cst_16 : f32 to vector<8x32xf32>
    %15 = arith.mulf %13, %14 : vector<8x32xf32>
    %c0_17 = arith.constant 0 : index
    %c0_18 = arith.constant 0 : index
    %16 = vector.load %arg6[%c0_17, %c0_18] : memref<32x32xf32, #tpu.memory_space<vmem>>, vector<32x32xf32>
    %cst_19 = arith.constant dense<0.000000e+00> : vector<12x32xf32>
    %17 = tpu.matmul %8, %16, %cst_19 {dimension_numbers = #tpu.dot_dimension_numbers<[1], [0], [0], [1], [0, 0, 1, 1], [], []>} : vector<12x32xf32>, vector<32x32xf32>, vector<12x32xf32> -> vector<12x32xf32>
    %c0_20 = arith.constant 0 : index
    %c0_21 = arith.constant 0 : index
    %18 = vector.load %arg7[%c0_20, %c0_21] : memref<1x32xf32, #tpu.memory_space<vmem>>, vector<1x32xf32>
    %19 = vector.broadcast %18 : vector<1x32xf32> to vector<12x32xf32>
    %20 = arith.addf %17, %19 : vector<12x32xf32>
    %c0_22 = arith.constant 0 : index
    %c0_23 = arith.constant 0 : index
    %21 = vector.load %arg8[%c0_22, %c0_23] : memref<32x32xf32, #tpu.memory_space<vmem>>, vector<32x32xf32>
    %cst_24 = arith.constant dense<0.000000e+00> : vector<12x32xf32>
    %22 = tpu.matmul %8, %21, %cst_24 {dimension_numbers = #tpu.dot_dimension_numbers<[1], [0], [0], [1], [0, 0, 1, 1], [], []>} : vector<12x32xf32>, vector<32x32xf32>, vector<12x32xf32> -> vector<12x32xf32>
    %c0_25 = arith.constant 0 : index
    %c0_26 = arith.constant 0 : index
    %23 = vector.load %arg9[%c0_25, %c0_26] : memref<1x32xf32, #tpu.memory_space<vmem>>, vector<1x32xf32>
    %24 = vector.broadcast %23 : vector<1x32xf32> to vector<12x32xf32>
    %25 = arith.addf %22, %24 : vector<12x32xf32>
    %c0_27 = arith.constant 0 : index
    %c0_28 = arith.constant 0 : index
    %26 = vector.load %arg10[%c0_27, %c0_28] : memref<32x32xf32, #tpu.memory_space<vmem>>, vector<32x32xf32>
    %cst_29 = arith.constant 0.000000e+00 : f32
    %27 = vector.broadcast %cst_29 : f32 to vector<8x32xf32>
    %28 = vector.extract_strided_slice %15 {offsets = [0, 0], sizes = [8, 8], strides = [1, 1]} : vector<8x32xf32> to vector<8x8xf32>
    %29 = vector.extract_strided_slice %20 {offsets = [0, 0], sizes = [12, 8], strides = [1, 1]} : vector<12x32xf32> to vector<12x8xf32>
    %30 = vector.extract_strided_slice %25 {offsets = [0, 0], sizes = [12, 8], strides = [1, 1]} : vector<12x32xf32> to vector<12x8xf32>
    %cst_30 = arith.constant dense<0.000000e+00> : vector<8x12xf32>
    %31 = tpu.matmul %28, %29, %cst_30 {dimension_numbers = #tpu.dot_dimension_numbers<[1], [1], [0], [0], [0, 0, 1, 0], [], []>} : vector<8x8xf32>, vector<12x8xf32>, vector<8x12xf32> -> vector<8x12xf32>
    %cst_31 = arith.constant dense<0xFF800000> : vector<8xf32>
    %32 = vector.multi_reduction <maximumf>, %31, %cst_31 [1] : vector<8x12xf32> to vector<8xf32>
    %33 = vector.shape_cast %32 : vector<8xf32> to vector<8x1xf32>
    %34 = vector.broadcast %33 : vector<8x1xf32> to vector<8x12xf32>
    %35 = arith.subf %31, %34 : vector<8x12xf32>
    %36 = math.exp %35 : vector<8x12xf32>
    %cst_32 = arith.constant dense<0.000000e+00> : vector<8xf32>
    %37 = vector.multi_reduction <add>, %36, %cst_32 [1] : vector<8x12xf32> to vector<8xf32>
    %38 = vector.shape_cast %37 : vector<8xf32> to vector<8x1xf32>
    %39 = vector.broadcast %38 : vector<8x1xf32> to vector<8x12xf32>
    %40 = arith.divf %36, %39 : vector<8x12xf32>
    %cst_33 = arith.constant dense<0.000000e+00> : vector<8x8xf32>
    %41 = tpu.matmul %40, %30, %cst_33 {dimension_numbers = #tpu.dot_dimension_numbers<[1], [0], [0], [1], [0, 0, 1, 1], [], []>} : vector<8x12xf32>, vector<12x8xf32>, vector<8x8xf32> -> vector<8x8xf32>
    %42 = vector.extract_strided_slice %26 {offsets = [0, 0], sizes = [8, 32], strides = [1, 1]} : vector<32x32xf32> to vector<8x32xf32>
    %cst_34 = arith.constant dense<0.000000e+00> : vector<8x32xf32>
    %43 = tpu.matmul %41, %42, %cst_34 {dimension_numbers = #tpu.dot_dimension_numbers<[1], [0], [0], [1], [0, 0, 1, 1], [], []>} : vector<8x8xf32>, vector<8x32xf32>, vector<8x32xf32> -> vector<8x32xf32>
    %44 = arith.addf %27, %43 : vector<8x32xf32>
    %45 = vector.extract_strided_slice %15 {offsets = [0, 8], sizes = [8, 8], strides = [1, 1]} : vector<8x32xf32> to vector<8x8xf32>
    %46 = vector.extract_strided_slice %20 {offsets = [0, 8], sizes = [12, 8], strides = [1, 1]} : vector<12x32xf32> to vector<12x8xf32>
    %47 = vector.extract_strided_slice %25 {offsets = [0, 8], sizes = [12, 8], strides = [1, 1]} : vector<12x32xf32> to vector<12x8xf32>
    %cst_35 = arith.constant dense<0.000000e+00> : vector<8x12xf32>
    %48 = tpu.matmul %45, %46, %cst_35 {dimension_numbers = #tpu.dot_dimension_numbers<[1], [1], [0], [0], [0, 0, 1, 0], [], []>} : vector<8x8xf32>, vector<12x8xf32>, vector<8x12xf32> -> vector<8x12xf32>
    %cst_36 = arith.constant dense<0xFF800000> : vector<8xf32>
    %49 = vector.multi_reduction <maximumf>, %48, %cst_36 [1] : vector<8x12xf32> to vector<8xf32>
    %50 = vector.shape_cast %49 : vector<8xf32> to vector<8x1xf32>
    %51 = vector.broadcast %50 : vector<8x1xf32> to vector<8x12xf32>
    %52 = arith.subf %48, %51 : vector<8x12xf32>
    %53 = math.exp %52 : vector<8x12xf32>
    %cst_37 = arith.constant dense<0.000000e+00> : vector<8xf32>
    %54 = vector.multi_reduction <add>, %53, %cst_37 [1] : vector<8x12xf32> to vector<8xf32>
    %55 = vector.shape_cast %54 : vector<8xf32> to vector<8x1xf32>
    %56 = vector.broadcast %55 : vector<8x1xf32> to vector<8x12xf32>
    %57 = arith.divf %53, %56 : vector<8x12xf32>
    %cst_38 = arith.constant dense<0.000000e+00> : vector<8x8xf32>
    %58 = tpu.matmul %57, %47, %cst_38 {dimension_numbers = #tpu.dot_dimension_numbers<[1], [0], [0], [1], [0, 0, 1, 1], [], []>} : vector<8x12xf32>, vector<12x8xf32>, vector<8x8xf32> -> vector<8x8xf32>
    %59 = vector.extract_strided_slice %26 {offsets = [8, 0], sizes = [8, 32], strides = [1, 1]} : vector<32x32xf32> to vector<8x32xf32>
    %cst_39 = arith.constant dense<0.000000e+00> : vector<8x32xf32>
    %60 = tpu.matmul %58, %59, %cst_39 {dimension_numbers = #tpu.dot_dimension_numbers<[1], [0], [0], [1], [0, 0, 1, 1], [], []>} : vector<8x8xf32>, vector<8x32xf32>, vector<8x32xf32> -> vector<8x32xf32>
    %61 = arith.addf %44, %60 : vector<8x32xf32>
    %62 = arith.addf %40, %57 : vector<8x12xf32>
    %63 = vector.extract_strided_slice %15 {offsets = [0, 16], sizes = [8, 8], strides = [1, 1]} : vector<8x32xf32> to vector<8x8xf32>
    %64 = vector.extract_strided_slice %20 {offsets = [0, 16], sizes = [12, 8], strides = [1, 1]} : vector<12x32xf32> to vector<12x8xf32>
    %65 = vector.extract_strided_slice %25 {offsets = [0, 16], sizes = [12, 8], strides = [1, 1]} : vector<12x32xf32> to vector<12x8xf32>
    %cst_40 = arith.constant dense<0.000000e+00> : vector<8x12xf32>
    %66 = tpu.matmul %63, %64, %cst_40 {dimension_numbers = #tpu.dot_dimension_numbers<[1], [1], [0], [0], [0, 0, 1, 0], [], []>} : vector<8x8xf32>, vector<12x8xf32>, vector<8x12xf32> -> vector<8x12xf32>
    %cst_41 = arith.constant dense<0xFF800000> : vector<8xf32>
    %67 = vector.multi_reduction <maximumf>, %66, %cst_41 [1] : vector<8x12xf32> to vector<8xf32>
    %68 = vector.shape_cast %67 : vector<8xf32> to vector<8x1xf32>
    %69 = vector.broadcast %68 : vector<8x1xf32> to vector<8x12xf32>
    %70 = arith.subf %66, %69 : vector<8x12xf32>
    %71 = math.exp %70 : vector<8x12xf32>
    %cst_42 = arith.constant dense<0.000000e+00> : vector<8xf32>
    %72 = vector.multi_reduction <add>, %71, %cst_42 [1] : vector<8x12xf32> to vector<8xf32>
    %73 = vector.shape_cast %72 : vector<8xf32> to vector<8x1xf32>
    %74 = vector.broadcast %73 : vector<8x1xf32> to vector<8x12xf32>
    %75 = arith.divf %71, %74 : vector<8x12xf32>
    %cst_43 = arith.constant dense<0.000000e+00> : vector<8x8xf32>
    %76 = tpu.matmul %75, %65, %cst_43 {dimension_numbers = #tpu.dot_dimension_numbers<[1], [0], [0], [1], [0, 0, 1, 1], [], []>} : vector<8x12xf32>, vector<12x8xf32>, vector<8x8xf32> -> vector<8x8xf32>
    %77 = vector.extract_strided_slice %26 {offsets = [16, 0], sizes = [8, 32], strides = [1, 1]} : vector<32x32xf32> to vector<8x32xf32>
    %cst_44 = arith.constant dense<0.000000e+00> : vector<8x32xf32>
    %78 = tpu.matmul %76, %77, %cst_44 {dimension_numbers = #tpu.dot_dimension_numbers<[1], [0], [0], [1], [0, 0, 1, 1], [], []>} : vector<8x8xf32>, vector<8x32xf32>, vector<8x32xf32> -> vector<8x32xf32>
    %79 = arith.addf %61, %78 : vector<8x32xf32>
    %80 = arith.addf %62, %75 : vector<8x12xf32>
    %81 = vector.extract_strided_slice %15 {offsets = [0, 24], sizes = [8, 8], strides = [1, 1]} : vector<8x32xf32> to vector<8x8xf32>
    %82 = vector.extract_strided_slice %20 {offsets = [0, 24], sizes = [12, 8], strides = [1, 1]} : vector<12x32xf32> to vector<12x8xf32>
    %83 = vector.extract_strided_slice %25 {offsets = [0, 24], sizes = [12, 8], strides = [1, 1]} : vector<12x32xf32> to vector<12x8xf32>
    %cst_45 = arith.constant dense<0.000000e+00> : vector<8x12xf32>
    %84 = tpu.matmul %81, %82, %cst_45 {dimension_numbers = #tpu.dot_dimension_numbers<[1], [1], [0], [0], [0, 0, 1, 0], [], []>} : vector<8x8xf32>, vector<12x8xf32>, vector<8x12xf32> -> vector<8x12xf32>
    %cst_46 = arith.constant dense<0xFF800000> : vector<8xf32>
    %85 = vector.multi_reduction <maximumf>, %84, %cst_46 [1] : vector<8x12xf32> to vector<8xf32>
    %86 = vector.shape_cast %85 : vector<8xf32> to vector<8x1xf32>
    %87 = vector.broadcast %86 : vector<8x1xf32> to vector<8x12xf32>
    %88 = arith.subf %84, %87 : vector<8x12xf32>
    %89 = math.exp %88 : vector<8x12xf32>
    %cst_47 = arith.constant dense<0.000000e+00> : vector<8xf32>
    %90 = vector.multi_reduction <add>, %89, %cst_47 [1] : vector<8x12xf32> to vector<8xf32>
    %91 = vector.shape_cast %90 : vector<8xf32> to vector<8x1xf32>
    %92 = vector.broadcast %91 : vector<8x1xf32> to vector<8x12xf32>
    %93 = arith.divf %89, %92 : vector<8x12xf32>
    %cst_48 = arith.constant dense<0.000000e+00> : vector<8x8xf32>
    %94 = tpu.matmul %93, %83, %cst_48 {dimension_numbers = #tpu.dot_dimension_numbers<[1], [0], [0], [1], [0, 0, 1, 1], [], []>} : vector<8x12xf32>, vector<12x8xf32>, vector<8x8xf32> -> vector<8x8xf32>
    %95 = vector.extract_strided_slice %26 {offsets = [24, 0], sizes = [8, 32], strides = [1, 1]} : vector<32x32xf32> to vector<8x32xf32>
    %cst_49 = arith.constant dense<0.000000e+00> : vector<8x32xf32>
    %96 = tpu.matmul %94, %95, %cst_49 {dimension_numbers = #tpu.dot_dimension_numbers<[1], [0], [0], [1], [0, 0, 1, 1], [], []>} : vector<8x8xf32>, vector<8x32xf32>, vector<8x32xf32> -> vector<8x32xf32>
    %97 = arith.addf %79, %96 : vector<8x32xf32>
    %98 = arith.addf %80, %93 : vector<8x12xf32>
    %99 = arith.addf %1, %97 : vector<8x32xf32>
    %c0_50 = arith.constant 0 : index
    %c0_51 = arith.constant 0 : index
    %100 = vector.load %arg11[%c0_50, %c0_51] : memref<1x32xf32, #tpu.memory_space<vmem>>, vector<1x32xf32>
    %101 = vector.broadcast %100 : vector<1x32xf32> to vector<8x32xf32>
    %102 = arith.addf %99, %101 : vector<8x32xf32>
    %cst_52 = arith.constant dense<0.000000e+00> : vector<8xf32>
    %103 = vector.multi_reduction <add>, %102, %cst_52 [1] : vector<8x32xf32> to vector<8xf32>
    %104 = vector.shape_cast %103 : vector<8xf32> to vector<8x1xf32>
    %cst_53 = arith.constant 3.200000e+01 : f32
    %105 = vector.broadcast %cst_53 : f32 to vector<8x1xf32>
    %106 = arith.divf %104, %105 : vector<8x1xf32>
    %107 = vector.broadcast %106 : vector<8x1xf32> to vector<8x32xf32>
    %108 = arith.subf %102, %107 : vector<8x32xf32>
    %109 = arith.mulf %108, %108 : vector<8x32xf32>
    %cst_54 = arith.constant dense<0.000000e+00> : vector<8xf32>
    %110 = vector.multi_reduction <add>, %109, %cst_54 [1] : vector<8x32xf32> to vector<8xf32>
    %111 = vector.shape_cast %110 : vector<8xf32> to vector<8x1xf32>
    %cst_55 = arith.constant 3.200000e+01 : f32
    %112 = vector.broadcast %cst_55 : f32 to vector<8x1xf32>
    %113 = arith.divf %111, %112 : vector<8x1xf32>
    %114 = vector.broadcast %106 : vector<8x1xf32> to vector<8x32xf32>
    %115 = arith.subf %102, %114 : vector<8x32xf32>
    %cst_56 = arith.constant 9.99999974E-6 : f32
    %116 = vector.broadcast %cst_56 : f32 to vector<8x1xf32>
    %117 = arith.addf %113, %116 : vector<8x1xf32>
    %118 = math.rsqrt %117 : vector<8x1xf32>
    %119 = vector.broadcast %118 : vector<8x1xf32> to vector<8x32xf32>
    %120 = arith.mulf %115, %119 : vector<8x32xf32>
    %121 = vector.broadcast %2 : vector<1x32xf32> to vector<8x32xf32>
    %122 = arith.mulf %120, %121 : vector<8x32xf32>
    %123 = vector.broadcast %3 : vector<1x32xf32> to vector<8x32xf32>
    %124 = arith.addf %122, %123 : vector<8x32xf32>
    %c0_57 = arith.constant 0 : index
    %c0_58 = arith.constant 0 : index
    %c0_59 = arith.constant 0 : index
    %125 = vector.load %arg14[%c0_57, %c0_58, %c0_59] : memref<1x8x32xf32, #tpu.memory_space<vmem>>, vector<1x8x32xf32>
    %126 = vector.shape_cast %125 : vector<1x8x32xf32> to vector<8x32xf32>
    %127 = vector.shape_cast %124 : vector<8x32xf32> to vector<1x8x32xf32>
    tpu.vector_store %arg14[%c0_57, %c0_58, %c0_59], %127 {strides = array<i32>} : memref<1x8x32xf32, #tpu.memory_space<vmem>>, vector<1x8x32xf32>,
    %cst_60 = arith.constant 2.500000e-01 : f32
    %128 = vector.broadcast %cst_60 : f32 to vector<8x12xf32>
    %129 = arith.mulf %98, %128 : vector<8x12xf32>
    %c0_61 = arith.constant 0 : index
    %c0_62 = arith.constant 0 : index
    %c0_63 = arith.constant 0 : index
    %130 = vector.load %arg15[%c0_61, %c0_62, %c0_63] : memref<1x8x12xf32, #tpu.memory_space<vmem>>, vector<1x8x12xf32>
    %131 = vector.shape_cast %130 : vector<1x8x12xf32> to vector<8x12xf32>
    %132 = vector.shape_cast %129 : vector<8x12xf32> to vector<1x8x12xf32>
    tpu.vector_store %arg15[%c0_61, %c0_62, %c0_63], %132 {strides = array<i32>} : memref<1x8x12xf32, #tpu.memory_space<vmem>>, vector<1x8x12xf32>,
    return
  }
  func.func @transform_0(%arg0: i32) -> (i32, i32, i32) {
    %c0_i32 = arith.constant 0 : i32
    %c0_i32_0 = arith.constant 0 : i32
    %c0_i32_1 = arith.constant 0 : i32
    return %arg0, %c0_i32, %c0_i32_0 : i32, i32, i32
  }
  func.func @transform_1(%arg0: i32) -> (i32, i32, i32) {
    %c0_i32 = arith.constant 0 : i32
    %c0_i32_0 = arith.constant 0 : i32
    %c0_i32_1 = arith.constant 0 : i32
    return %arg0, %c0_i32, %c0_i32_0 : i32, i32, i32
  }
  func.func @transform_2(%arg0: i32) -> (i32, i32, i32) {
    %c0_i32 = arith.constant 0 : i32
    %c0_i32_0 = arith.constant 0 : i32
    %c0_i32_1 = arith.constant 0 : i32
    return %arg0, %c0_i32, %c0_i32_0 : i32, i32, i32
  }
  func.func @transform_3(%arg0: i32) -> (i32, i32) {
    %c0_i32 = arith.constant 0 : i32
    %c0_i32_0 = arith.constant 0 : i32
    %c0_i32_1 = arith.constant 0 : i32
    return %c0_i32, %c0_i32_0 : i32, i32
  }
  func.func @transform_4(%arg0: i32) -> (i32, i32) {
    %c0_i32 = arith.constant 0 : i32
    %c0_i32_0 = arith.constant 0 : i32
    %c0_i32_1 = arith.constant 0 : i32
    return %c0_i32, %c0_i32_0 : i32, i32
  }
  func.func @transform_5(%arg0: i32) -> (i32, i32) {
    %c0_i32 = arith.constant 0 : i32
    %c0_i32_0 = arith.constant 0 : i32
    %c0_i32_1 = arith.constant 0 : i32
    return %c0_i32, %c0_i32_0 : i32, i32
  }
  func.func @transform_6(%arg0: i32) -> (i32, i32) {
    %c0_i32 = arith.constant 0 : i32
    %c0_i32_0 = arith.constant 0 : i32
    %c0_i32_1 = arith.constant 0 : i32
    return %c0_i32, %c0_i32_0 : i32, i32
  }
  func.func @transform_7(%arg0: i32) -> (i32, i32) {
    %c0_i32 = arith.constant 0 : i32
    %c0_i32_0 = arith.constant 0 : i32
    %c0_i32_1 = arith.constant 0 : i32
    return %c0_i32, %c0_i32_0 : i32, i32
  }
  func.func @transform_8(%arg0: i32) -> (i32, i32) {
    %c0_i32 = arith.constant 0 : i32
    %c0_i32_0 = arith.constant 0 : i32
    %c0_i32_1 = arith.constant 0 : i32
    return %c0_i32, %c0_i32_0 : i32, i32
  }
  func.func @transform_9(%arg0: i32) -> (i32, i32) {
    %c0_i32 = arith.constant 0 : i32
    %c0_i32_0 = arith.constant 0 : i32
    %c0_i32_1 = arith.constant 0 : i32
    return %c0_i32, %c0_i32_0 : i32, i32
  }
  func.func @transform_10(%arg0: i32) -> (i32, i32) {
    %c0_i32 = arith.constant 0 : i32
    %c0_i32_0 = arith.constant 0 : i32
    %c0_i32_1 = arith.constant 0 : i32
    return %c0_i32, %c0_i32_0 : i32, i32
  }
  func.func @transform_11(%arg0: i32) -> (i32, i32) {
    %c0_i32 = arith.constant 0 : i32
    %c0_i32_0 = arith.constant 0 : i32
    %c0_i32_1 = arith.constant 0 : i32
    return %c0_i32, %c0_i32_0 : i32, i32
  }
  func.func @transform_12(%arg0: i32) -> (i32, i32) {
    %c0_i32 = arith.constant 0 : i32
    %c0_i32_0 = arith.constant 0 : i32
    %c0_i32_1 = arith.constant 0 : i32
    return %c0_i32, %c0_i32_0 : i32, i32
  }
  func.func @transform_13(%arg0: i32) -> (i32, i32, i32) {
    %c0_i32 = arith.constant 0 : i32
    %c0_i32_0 = arith.constant 0 : i32
    %c0_i32_1 = arith.constant 0 : i32
    return %arg0, %c0_i32, %c0_i32_0 : i32, i32, i32
  }
  func.func @transform_14(%arg0: i32) -> (i32, i32, i32) {
    %c0_i32 = arith.constant 0 : i32
    %c0_i32_0 = arith.constant 0 : i32
    %c0_i32_1 = arith.constant 0 : i32
    return %arg0, %c0_i32, %c0_i32_0 : i32, i32, i32
  }
}

module attributes {stable_mosaic.version = 11 : i64} {
  func.func @_ffn_block_kernel(%arg0: i32, %arg1: i32, %arg2: memref<16x32xf32, #tpu.memory_space<vmem>>, %arg3: memref<32x64xf32, #tpu.memory_space<vmem>>, %arg4: memref<1x64xf32, #tpu.memory_space<vmem>>, %arg5: memref<64x32xf32, #tpu.memory_space<vmem>>, %arg6: memref<1x32xf32, #tpu.memory_space<vmem>>, %arg7: memref<1x32xf32, #tpu.memory_space<vmem>>, %arg8: memref<1x32xf32, #tpu.memory_space<vmem>>, %arg9: memref<16x32xf32, #tpu.memory_space<vmem>>, %arg10: memref<16x32xf32, #tpu.memory_space<vmem>>) attributes {dimension_semantics = [#tpu.dimension_semantics<parallel>, #tpu.dimension_semantics<arbitrary>], iteration_bounds = array<i64: 1, 1>, scalar_prefetch = 0 : i64, scratch_operands = 1 : i64, tpu.core_type = #tpu.core_type<tc>, window_params = [{transform_indices = @transform_0, window_bounds = array<i64: 16, 32>}, {transform_indices = @transform_1, window_bounds = array<i64: 32, 64>}, {transform_indices = @transform_2, window_bounds = array<i64: 1, 64>}, {transform_indices = @transform_3, window_bounds = array<i64: 64, 32>}, {pipeline_mode = #tpu.pipeline_mode<synchronous>, transform_indices = @transform_4, window_bounds = array<i64: 1, 32>}, {pipeline_mode = #tpu.pipeline_mode<synchronous>, transform_indices = @transform_5, window_bounds = array<i64: 1, 32>}, {pipeline_mode = #tpu.pipeline_mode<synchronous>, transform_indices = @transform_6, window_bounds = array<i64: 1, 32>}, {transform_indices = @transform_7, window_bounds = array<i64: 16, 32>}]} {
    %c0_i32 = arith.constant 0 : i32
    %0 = arith.cmpi eq, %arg1, %c0_i32 : i32
    %1 = arith.extui %0 : i1 to i32
    %c0_i32_0 = arith.constant 0 : i32
    %2 = arith.cmpi ne, %1, %c0_i32_0 : i32
    scf.if %2 {
      %cst_20 = arith.constant 0.000000e+00 : f32
      %21 = vector.broadcast %cst_20 : f32 to vector<16x32xf32>
      %c0_21 = arith.constant 0 : index
      %c0_22 = arith.constant 0 : index
      %22 = vector.load %arg10[%c0_21, %c0_22] : memref<16x32xf32, #tpu.memory_space<vmem>>, vector<16x32xf32>
      tpu.vector_store %arg10[%c0_21, %c0_22], %21 {strides = array<i32>} : memref<16x32xf32, #tpu.memory_space<vmem>>, vector<16x32xf32>,
    } else {
    }
    %c0 = arith.constant 0 : index
    %c0_1 = arith.constant 0 : index
    %3 = vector.load %arg2[%c0, %c0_1] : memref<16x32xf32, #tpu.memory_space<vmem>>, vector<16x32xf32>
    %c0_2 = arith.constant 0 : index
    %c0_3 = arith.constant 0 : index
    %4 = vector.load %arg7[%c0_2, %c0_3] : memref<1x32xf32, #tpu.memory_space<vmem>>, vector<1x32xf32>
    %c0_4 = arith.constant 0 : index
    %c0_5 = arith.constant 0 : index
    %5 = vector.load %arg8[%c0_4, %c0_5] : memref<1x32xf32, #tpu.memory_space<vmem>>, vector<1x32xf32>
    %c0_6 = arith.constant 0 : index
    %c0_7 = arith.constant 0 : index
    %6 = vector.load %arg3[%c0_6, %c0_7] : memref<32x64xf32, #tpu.memory_space<vmem>>, vector<32x64xf32>
    %cst = arith.constant dense<0.000000e+00> : vector<16x64xf32>
    %7 = tpu.matmul %3, %6, %cst {dimension_numbers = #tpu.dot_dimension_numbers<[1], [0], [0], [1], [0, 0, 1, 1], [], []>} : vector<16x32xf32>, vector<32x64xf32>, vector<16x64xf32> -> vector<16x64xf32>
    %c0_8 = arith.constant 0 : index
    %c0_9 = arith.constant 0 : index
    %8 = vector.load %arg4[%c0_8, %c0_9] : memref<1x64xf32, #tpu.memory_space<vmem>>, vector<1x64xf32>
    %9 = vector.broadcast %8 : vector<1x64xf32> to vector<16x64xf32>
    %10 = arith.addf %7, %9 : vector<16x64xf32>
    %cst_10 = arith.constant 0.000000e+00 : f32
    %11 = vector.broadcast %cst_10 : f32 to vector<16x64xf32>
    %12 = arith.maximumf %10, %11 : vector<16x64xf32>
    %c0_11 = arith.constant 0 : index
    %c0_12 = arith.constant 0 : index
    %13 = vector.load %arg10[%c0_11, %c0_12] : memref<16x32xf32, #tpu.memory_space<vmem>>, vector<16x32xf32>
    %c0_13 = arith.constant 0 : index
    %c0_14 = arith.constant 0 : index
    %14 = vector.load %arg5[%c0_13, %c0_14] : memref<64x32xf32, #tpu.memory_space<vmem>>, vector<64x32xf32>
    %cst_15 = arith.constant dense<0.000000e+00> : vector<16x32xf32>
    %15 = tpu.matmul %12, %14, %cst_15 {dimension_numbers = #tpu.dot_dimension_numbers<[1], [0], [0], [1], [0, 0, 1, 1], [], []>} : vector<16x64xf32>, vector<64x32xf32>, vector<16x32xf32> -> vector<16x32xf32>
    %16 = arith.addf %13, %15 : vector<16x32xf32>
    %c0_16 = arith.constant 0 : index
    %c0_17 = arith.constant 0 : index
    %17 = vector.load %arg10[%c0_16, %c0_17] : memref<16x32xf32, #tpu.memory_space<vmem>>, vector<16x32xf32>
    tpu.vector_store %arg10[%c0_16, %c0_17], %16 {strides = array<i32>} : memref<16x32xf32, #tpu.memory_space<vmem>>, vector<16x32xf32>,
    %c0_i32_18 = arith.constant 0 : i32
    %18 = arith.cmpi eq, %arg1, %c0_i32_18 : i32
    %19 = arith.extui %18 : i1 to i32
    %c0_i32_19 = arith.constant 0 : i32
    %20 = arith.cmpi ne, %19, %c0_i32_19 : i32
    scf.if %20 {
      %c0_20 = arith.constant 0 : index
      %c0_21 = arith.constant 0 : index
      %21 = vector.load %arg10[%c0_20, %c0_21] : memref<16x32xf32, #tpu.memory_space<vmem>>, vector<16x32xf32>
      %22 = arith.addf %3, %21 : vector<16x32xf32>
      %c0_22 = arith.constant 0 : index
      %c0_23 = arith.constant 0 : index
      %23 = vector.load %arg6[%c0_22, %c0_23] : memref<1x32xf32, #tpu.memory_space<vmem>>, vector<1x32xf32>
      %24 = vector.broadcast %23 : vector<1x32xf32> to vector<16x32xf32>
      %25 = arith.addf %22, %24 : vector<16x32xf32>
      %cst_24 = arith.constant dense<0.000000e+00> : vector<16xf32>
      %26 = vector.multi_reduction <add>, %25, %cst_24 [1] : vector<16x32xf32> to vector<16xf32>
      %27 = vector.shape_cast %26 : vector<16xf32> to vector<16x1xf32>
      %cst_25 = arith.constant 3.200000e+01 : f32
      %28 = vector.broadcast %cst_25 : f32 to vector<16x1xf32>
      %29 = arith.divf %27, %28 : vector<16x1xf32>
      %30 = vector.broadcast %29 : vector<16x1xf32> to vector<16x32xf32>
      %31 = arith.subf %25, %30 : vector<16x32xf32>
      %32 = arith.mulf %31, %31 : vector<16x32xf32>
      %cst_26 = arith.constant dense<0.000000e+00> : vector<16xf32>
      %33 = vector.multi_reduction <add>, %32, %cst_26 [1] : vector<16x32xf32> to vector<16xf32>
      %34 = vector.shape_cast %33 : vector<16xf32> to vector<16x1xf32>
      %cst_27 = arith.constant 3.200000e+01 : f32
      %35 = vector.broadcast %cst_27 : f32 to vector<16x1xf32>
      %36 = arith.divf %34, %35 : vector<16x1xf32>
      %37 = vector.broadcast %29 : vector<16x1xf32> to vector<16x32xf32>
      %38 = arith.subf %25, %37 : vector<16x32xf32>
      %cst_28 = arith.constant 9.99999974E-6 : f32
      %39 = vector.broadcast %cst_28 : f32 to vector<16x1xf32>
      %40 = arith.addf %36, %39 : vector<16x1xf32>
      %41 = math.rsqrt %40 : vector<16x1xf32>
      %42 = vector.broadcast %41 : vector<16x1xf32> to vector<16x32xf32>
      %43 = arith.mulf %38, %42 : vector<16x32xf32>
      %44 = vector.broadcast %4 : vector<1x32xf32> to vector<16x32xf32>
      %45 = arith.mulf %43, %44 : vector<16x32xf32>
      %46 = vector.broadcast %5 : vector<1x32xf32> to vector<16x32xf32>
      %47 = arith.addf %45, %46 : vector<16x32xf32>
      %c0_29 = arith.constant 0 : index
      %c0_30 = arith.constant 0 : index
      %48 = vector.load %arg9[%c0_29, %c0_30] : memref<16x32xf32, #tpu.memory_space<vmem>>, vector<16x32xf32>
      tpu.vector_store %arg9[%c0_29, %c0_30], %47 {strides = array<i32>} : memref<16x32xf32, #tpu.memory_space<vmem>>, vector<16x32xf32>,
    } else {
    }
    return
  }
  func.func @transform_0(%arg0: i32, %arg1: i32) -> (i32, i32) {
    %c0_i32 = arith.constant 0 : i32
    %c0_i32_0 = arith.constant 0 : i32
    return %arg0, %c0_i32 : i32, i32
  }
  func.func @transform_1(%arg0: i32, %arg1: i32) -> (i32, i32) {
    %c0_i32 = arith.constant 0 : i32
    %c0_i32_0 = arith.constant 0 : i32
    return %c0_i32, %arg1 : i32, i32
  }
  func.func @transform_2(%arg0: i32, %arg1: i32) -> (i32, i32) {
    %c0_i32 = arith.constant 0 : i32
    %c0_i32_0 = arith.constant 0 : i32
    return %c0_i32, %arg1 : i32, i32
  }
  func.func @transform_3(%arg0: i32, %arg1: i32) -> (i32, i32) {
    %c0_i32 = arith.constant 0 : i32
    %c0_i32_0 = arith.constant 0 : i32
    return %arg1, %c0_i32 : i32, i32
  }
  func.func @transform_4(%arg0: i32, %arg1: i32) -> (i32, i32) {
    %c0_i32 = arith.constant 0 : i32
    %c0_i32_0 = arith.constant 0 : i32
    %c0_i32_1 = arith.constant 0 : i32
    return %c0_i32, %c0_i32_0 : i32, i32
  }
  func.func @transform_5(%arg0: i32, %arg1: i32) -> (i32, i32) {
    %c0_i32 = arith.constant 0 : i32
    %c0_i32_0 = arith.constant 0 : i32
    %c0_i32_1 = arith.constant 0 : i32
    return %c0_i32, %c0_i32_0 : i32, i32
  }
  func.func @transform_6(%arg0: i32, %arg1: i32) -> (i32, i32) {
    %c0_i32 = arith.constant 0 : i32
    %c0_i32_0 = arith.constant 0 : i32
    %c0_i32_1 = arith.constant 0 : i32
    return %c0_i32, %c0_i32_0 : i32, i32
  }
  func.func @transform_7(%arg0: i32, %arg1: i32) -> (i32, i32) {
    %c0_i32 = arith.constant 0 : i32
    %c0_i32_0 = arith.constant 0 : i32
    return %arg0, %c0_i32 : i32, i32
  }
}

</mosaic_0001>

<bundles_post_ra>
// kernel: transformer_decoder_layer.5
= control target key start
LH: loop header
LB: loop body
LE: loop exit
PB: predicated region body
PF: predicated region fallthrough
CT: control target
= control target key end

     0   :  { %vm31_vm0 = vcmask 261120   ;;  %s387_s0 = inlined_call_operand.vmem [shape: f32[16,32], index: 0, kind: input, shape index: {}]   ;;  %s388_s1 = inlined_call_operand.vmem [shape: f32[32,64], index: 1, kind: input, shape index: {}]   ;;  %s389_s2 = inlined_call_operand.vmem [shape: f32[1,64], index: 2, kind: input, shape index: {}]   ;;  %s390_s3 = inlined_call_operand.vmem [shape: f32[64,32], index: 3, kind: input, shape index: {}]   ;;  %s391_s4 = inlined_call_operand.vmem [shape: f32[1,32], index: 4, kind: input, shape index: {}]   ;;  %s392_s5 = inlined_call_operand.vmem [shape: f32[1,32], index: 5, kind: input, shape index: {}]   ;;  %s393_s6 = inlined_call_operand.vmem [shape: f32[1,32], index: 6, kind: input, shape index: {}]   ;;  %s394_s7 = inlined_call_operand.hbm [shape: f32[16,32], index: 7, kind: output, shape index: {}]  }
   0x1   :  { %v41_v0 = vld [vmem:[%s388_s1 + $0x18] sm:$0xff]  ;;  %v40_v1 = vld [vmem:[%s388_s1 + $0x10] sm:$0xff]  ;;  %v39_v2 = vld [vmem:[%s388_s1 + $0x8] sm:$0xff] }
   0x2   :  { %65 = vmatpush.msra.mxu0 %v41_v0  ;;  %220 = vmatpush.msra.mxu3 %v41_v0  ;;  %v87_v3 = vld [vmem:[%s390_s3 + $0x38] sm:$0xff]  ;;  %v38_v4 = vld [vmem:[%s388_s1] sm:$0xff]  ;;  %v86_v5 = vld [vmem:[%s390_s3 + $0x30] sm:$0xff] }
   0x3   :  { %v34_v6 = vld [vmem:[%s387_s0] sm:$0xff]  ;;  %103 = vmatpush.msra.mxu1 %v87_v3  ;;  %224 = vmatpush.msra.mxu2 %v87_v3  ;;  %v35_v7 = vld [vmem:[%s387_s0 + $0x8] sm:$0xff] }
   0x4   :  { %66 = vmatpush.msra.mxu0 %v40_v1  ;;  %221 = vmatpush.msra.mxu3 %v40_v1 }
   0x6   :  { %67 = vmatpush.msra.mxu0 %v39_v2  ;;  %222 = vmatpush.msra.mxu3 %v39_v2 }
   0x7   :  { %12 = vsyncpa [#allocation4], 0  ;;  %104 = vmatpush.msra.mxu1 %v86_v5  ;;  %v85_v8 = vld [vmem:[%s390_s3 + $0x28] sm:$0xff]  ;;  %225 = vmatpush.msra.mxu2 %v86_v5  ;;  %v84_v9 = vld [vmem:[%s390_s3 + $0x20] sm:$0xff]  ;;  %v273_v14 = vmov 0.0   ;;  %vm88_vm1 = vcmask 523264  }
   0x8   :  { %68 = vmatpush.msra.mxu0 %v38_v4  ;;  %223 = vmatpush.msra.mxu3 %v38_v4  ;;  %v83_v10 = vld [vmem:[%s390_s3 + $0x18] sm:$0xff]  ;;  %v82_v11 = vld [vmem:[%s390_s3 + $0x10] sm:$0xff]  ;;  %v81_v12 = vld [vmem:[%s390_s3 + $0x8] sm:$0xff]  ;;  %32 = vst.msk [vmem:[#allocation2] sm:$0xff] %vm31_vm0, %v273_v14  ;;  %v274_v37 = vmov 32.0   ;;  %s276_s12 = smov 128  }
   0x9   :  { %216 = vmatmul.msk.f32.vlgmr.msra.gmra.mxu0 %vm31_vm0, %v34_v6  ;;  %217 = vmatmul.msk.f32.vlgmr.msra.gmra.mxu3 %vm31_vm0, %v35_v7  ;;  %v80_v13 = vld [vmem:[%s390_s3] sm:$0xff]  ;;  %33 = vst.msk [vmem:[#allocation2 + $0x8] sm:$0xff] %vm31_vm0, %v273_v14  ;;  %241 = vrcp.f32 %v274_v37  ;;  %s277_s13 = smov 8  }
   0xa   :  { %105 = vmatpush.msra.mxu1 %v85_v8  ;;  %226 = vmatpush.msra.mxu2 %v85_v8  ;;  %v237_v15 = vld [vmem:[%s389_s2] ss:$0 sm:$0xff] }
   0xb   :  { %v238_v25 = vld [vmem:[%s391_s4] ss:$0 sm:$0xff] }
   0xc   :  { %106 = vmatpush.msra.mxu1 %v84_v9  ;;  %227 = vmatpush.msra.mxu2 %v84_v9  ;;  %v239_v2 = vld [vmem:[%s392_s5] ss:$0 sm:$0xff]  ;;  %s275_s5 = smov [#allocation3]  }
   0xd   :  { %s202_s9 = sshll.u32 %s275_s5, 4  ;;  %s203_s9 = int_to_ptr.vmem [resolvable:$true] %s202_s9 }
   0xe   :  { %107 = vmatpush.msra.mxu1 %v83_v10  ;;  %228 = vmatpush.msra.mxu2 %v83_v10 }
   0xf   :  { %v78_v22 = vld [vmem:[#allocation2] sm:$0xff]  ;;  %v242_v38 = vpop.eup %241 }
  0x10   :  { %108 = vmatpush.msra.mxu1 %v82_v11  ;;  %229 = vmatpush.msra.mxu2 %v82_v11  ;;  %v79_v26 = vld [vmem:[#allocation2 + $0x8] sm:$0xff]  ;;  %v142_v39 = vmul.f32 32.0, %v242_v38  ;;  %vm146_vm2 = vweird.f32 %v242_v38 }
  0x12   :  { %109 = vmatpush.msra.mxu1 %v81_v12  ;;  %230 = vmatpush.msra.mxu2 %v81_v12  ;;  %v143_v40 = vsub.f32 1.0, %v142_v39 }
  0x14   :  { %110 = vmatpush.msra.mxu1 %v80_v13  ;;  %231 = vmatpush.msra.mxu2 %v80_v13  ;;  %v144_v41 = vmul.f32 %v242_v38, %v143_v40 }
  0x16   :  { %v145_v42 = vadd.f32 %v242_v38, %v144_v41 }
  0x18   :  { %v147_v43 = vsel %vm146_vm2, %v242_v38, %v145_v42 }
  0x86   :  { %v70_v16 = vpop.f32.mrf.mxu0 }
  0x87   :  { %v71_v17 = vadd.f32 %v237_v15, %v70_v16 }
  0x89   :  { %v76_v18 = vmax.f32 %v71_v17, 0.0 }
  0x8b   :  { %218 = vmatmul.msk.f32.vlgmr.msra.gmra.mxu1 %vm88_vm1, %v76_v18 }
  0x8c   :  { %v73_v19 = vpop.f32.mrf.mxu3 }
  0x8d   :  { %v74_v20 = vadd.f32 %v237_v15, %v73_v19 }
  0x8f   :  { %v77_v21 = vmax.f32 %v74_v20, 0.0 }
  0x91   :  { %219 = vmatmul.msk.f32.vlgmr.msra.gmra.mxu2 %vm88_vm1, %v77_v21 }
 0x108   :  { %v112_v23 = vpop.f32.mrf.mxu1 }
 0x109   :  { %v118_v24 = vadd.f32 %v112_v23, %v78_v22 }
 0x10b   :  { %120 = vst.msk [vmem:[#allocation2] sm:$0xff] %vm31_vm0, %v118_v24 }
 0x112   :  { %v125_v27 = vld [vmem:[#allocation2] sm:$0xff] }
 0x113   :  { %v127_v28 = vadd.f32 %v125_v27, %v34_v6  ;;  %v240_v6 = vld [vmem:[%s393_s6] ss:$0 sm:$0xff]  ;;  %s204_s6 = sshll.u32 %s394_s7, 4  ;;  %s205_s6 = int_to_ptr.hbm [resolvable:$true] %s204_s6 }
 0x114   :  { %v115_v29 = vpop.f32.mrf.mxu2 }
 0x115   :  { %v119_v30 = vadd.f32 %v115_v29, %v79_v26  ;;  %v133_v31 = vadd.f32 %v238_v25, %v127_v28 }
 0x117   :  { %121 = vst.msk [vmem:[#allocation2 + $0x8] sm:$0xff] %vm31_vm0, %v119_v30  ;;  %v135_v32 = vsel %vm31_vm0, %v133_v31, 0.0 }
 0x118   :  { %136 = vadd.xlane.f32.xlu0 %v135_v32 }
 0x11e   :  { %v126_v33 = vld [vmem:[#allocation2 + $0x8] sm:$0xff] }
 0x11f   :  { %v128_v34 = vadd.f32 %v126_v33, %v35_v7 }
 0x121   :  { %v134_v35 = vadd.f32 %v238_v25, %v128_v34 }
 0x123   :  { %v138_v36 = vsel %vm31_vm0, %v134_v35, 0.0 }
 0x124   :  { %139 = vadd.xlane.f32.xlu0 %v138_v36 }
 0x18b   :  { %v137_v44 = vpop.xlane.xlu0 %136 }
 0x18c   :  { %v148_v45 = vmul.f32 %v147_v43, %v137_v44 }
 0x18e   :  { %v150_v46 = vsub.f32 %v133_v31, %v148_v45 }
 0x190   :  { %v152_v47 = vmul.f32 %v150_v46, %v150_v46 }
 0x192   :  { %v154_v48 = vsel %vm31_vm0, %v152_v47, 0.0 }
 0x193   :  { %155 = vadd.xlane.f32.xlu1 %v154_v48 }
 0x197   :  { %v140_v49 = vpop.xlane.xlu0 %139 }
 0x198   :  { %v149_v50 = vmul.f32 %v147_v43, %v140_v49 }
 0x19a   :  { %v151_v51 = vsub.f32 %v134_v35, %v149_v50 }
 0x19c   :  { %v153_v52 = vmul.f32 %v151_v51, %v151_v51 }
 0x19e   :  { %v157_v53 = vsel %vm31_vm0, %v153_v52, 0.0 }
 0x19f   :  { %158 = vadd.xlane.f32.xlu1 %v157_v53 }
 0x206   :  { %v156_v54 = vpop.xlane.xlu1 %155 }
 0x207   :  { %v160_v55 = vmul.f32 %v156_v54, %v147_v43 }
 0x209   :  { %v162_v56 = vadd.f32 1e-05, %v160_v55 }
 0x20b   :  { %243 = vrsqrt.f32 %v162_v56  ;;  %vm170_vm4 = vweird.f32 %v162_v56 }
 0x211   :  { %v244_v57 = vpop.eup %243 }
 0x212   :  { %v165_v58 = vmul.f32 %v244_v57, %v162_v56  ;;  %v159_v59 = vpop.xlane.xlu1 %158  ;;  %vm171_vm3 = vweird.f32 %v244_v57 }
 0x213   :  { %v161_v60 = vmul.f32 %v159_v59, %v147_v43  ;;  %vm172_vm5 = vmor %vm170_vm4, %vm171_vm3 }
 0x214   :  { %v166_v61 = vmul.f32 %v244_v57, %v165_v58 }
 0x215   :  { %v163_v62 = vadd.f32 1e-05, %v161_v60 }
 0x216   :  { %v167_v63 = vmul.f32 0.5, %v166_v61 }
 0x217   :  { %245 = vrsqrt.f32 %v163_v62  ;;  %vm180_vm7 = vweird.f32 %v163_v62 }
 0x218   :  { %v168_v0 = vsub.f32 1.5, %v167_v63 }
 0x21a   :  { %v169_v1 = vmul.f32 %v244_v57, %v168_v0 }
 0x21c   :  { %v173_v3 = vsel %vm172_vm5, %v244_v57, %v169_v1 }
 0x21d   :  { %v246_v4 = vpop.eup %245  ;;  %v184_v5 = vmul.f32 %v173_v3, %v150_v46 }
 0x21e   :  { %v175_v7 = vmul.f32 %v246_v4, %v163_v62  ;;  %vm181_vm6 = vweird.f32 %v246_v4 }
 0x21f   :  { %v189_v8 = vmul.f32 %v239_v2, %v184_v5  ;;  %vm182_vm8 = vmor %vm180_vm7, %vm181_vm6 }
 0x220   :  { %v176_v9 = vmul.f32 %v246_v4, %v175_v7 }
 0x221   :  { %v194_v10 = vadd.f32 %v240_v6, %v189_v8 }
 0x222   :  { %v177_v11 = vmul.f32 0.5, %v176_v9 }
 0x223   :  { %196 = vst.msk [vmem:[#allocation3] sm:$0xff] %vm31_vm0, %v194_v10 }
 0x224   :  { %v178_v12 = vsub.f32 1.5, %v177_v11 }
 0x226   :  { %v179_v13 = vmul.f32 %v246_v4, %v178_v12 }
 0x228   :  { %v183_v14 = vsel %vm182_vm8, %v246_v4, %v179_v13 }
 0x229   :  { %v185_v15 = vmul.f32 %v183_v14, %v151_v51 }
 0x22b   :  { %v190_v16 = vmul.f32 %v239_v2, %v185_v15 }
 0x22d   :  { %v195_v17 = vadd.f32 %v240_v6, %v190_v16 }
 0x22f   :  { %197 = vst.msk [vmem:[#allocation3 + $0x8] sm:$0xff] %vm31_vm0, %v195_v17 }
 0x230   :  { %210 = dma.vmem_to_hbm [thread:$0]  %s203_s9, 256, %s205_s6, [#allocation4], %s276_s12, %s276_s12, %s277_s13  }
 0x231   :  { %271 = dma.done.wait [#allocation4], 256  }
 0x232   :  { %272 = vsyncadd [#allocation4], 4294967040 }
 0x233   :  { %215 = vsyncpa [#allocation4], 1 }

// kernel: transformer_decoder_layer.3
= control target key start
LH: loop header
LB: loop body
LE: loop exit
PB: predicated region body
PF: predicated region fallthrough
CT: control target
= control target key end

     0   :  { %s2216_s0 = inlined_call_operand.hbm [shape: f32[2,8,32], index: 0, kind: input, shape index: {}]   ;;  %s2217_s1 = inlined_call_operand.hbm [shape: f32[2,8,32], index: 1, kind: input, shape index: {}]   ;;  %s2218_s2 = inlined_call_operand.hbm [shape: f32[32,32], index: 2, kind: input, shape index: {}]   ;;  %s2219_s3 = inlined_call_operand.vmem [shape: f32[1,32], index: 3, kind: input, shape index: {}]   ;;  %s2220_s4 = inlined_call_operand.hbm [shape: f32[32,32], index: 4, kind: input, shape index: {}]   ;;  %s2221_s5 = inlined_call_operand.hbm [shape: f32[1,32], index: 5, kind: input, shape index: {}]   ;;  %s2222_s6 = inlined_call_operand.hbm [shape: f32[32,32], index: 6, kind: input, shape index: {}]   ;;  %s2223_s7 = inlined_call_operand.hbm [shape: f32[1,32], index: 7, kind: input, shape index: {}]   ;;  %s2224_s8 = inlined_call_operand.hbm [shape: f32[32,32], index: 8, kind: input, shape index: {}]   ;;  %s2225_s9 = inlined_call_operand.hbm [shape: f32[1,32], index: 9, kind: input, shape index: {}]   ;;  %s2226_s10 = inlined_call_operand.hbm [shape: f32[1,32], index: 10, kind: input, shape index: {}]   ;;  %s2227_s11 = inlined_call_operand.hbm [shape: f32[1,32], index: 11, kind: input, shape index: {}]   ;;  %s2228_s12 = inlined_call_operand.vmem [shape: f32[2,8,32], index: 12, kind: output, shape index: {}]  }
   0x1   :  { %2229 = sst [smem:[#allocation26_spill]] %s2218_s2 }
   0x2   :  { %2230 = sst [smem:[#allocation27_spill]] %s2219_s3 }
   0x3   :  { %2231 = sst [smem:[#allocation28_spill]] %s2220_s4 }
   0x4   :  { %2232 = sst [smem:[#allocation29_spill]] %s2221_s5 }
   0x5   :  { %2233 = sst [smem:[#allocation30_spill]] %s2222_s6 }
   0x6   :  { %2234 = sst [smem:[#allocation31_spill]] %s2223_s7 }
   0x7   :  { %2235 = sst [smem:[#allocation32_spill]] %s2228_s12 }
   0x8   :  { %17 = vsyncpa [#allocation3], 0 }
   0x9   :  { %19 = vsyncpa [#allocation3 + $0x1], 0 }
   0xa   :  { %20 = vsyncpa [#allocation5], 0 }
   0xb   :  { %22 = vsyncpa [#allocation5 + $0x1], 0 }
   0xc   :  { %23 = vsyncpa [#allocation8], 0 }
   0xd   :  { %24 = vsyncpa [#allocation11], 0 }
   0xe   :  { %25 = vsyncpa [#allocation14], 0 }
   0xf   :  { %26 = vsyncpa [#allocation17], 0  ;;  %s1964_s21 = smov 0   ;;  %s1966_s22 = smov 0  }
  0x10   :  { %s1968_s23 = smov 0   ;;  %s1970_s24 = smov 0  }
  0x11 LB: > { %s2236_s2 = sld [smem:[#allocation26_spill]]  ;;  %s1988_s28 = sadd.s32 4294967295, %s1882_s24   ;;  %s1882_s24 = sphi %s1970_s24, %s2250_s24   ;;  %s1878_s23 = sphi %s1968_s23, %s2249_s23   ;;  %s1874_s22 = sphi %s1966_s22, %s2248_s22   ;;  %s1870_s21 = sphi %s1964_s21, %s2247_s21  }
  0x12   : > { %p1278_p0 = scmp.ge.s32.totalorder %s1882_s24, 1  ;;  %p53_p1 = scmp.eq.s32.totalorder %s1988_s28, 0 }
  0x13   : > { %p325_p2 = scmp.lt.s32.totalorder %s1882_s24, 3  ;;  %s1884_s30 = smov [#allocation6]  }
  0x14   : > { %s338_s13 = sshll.u32 %s1884_s30, 4  ;;  %s2238_s4 = sld [smem:[#allocation28_spill]]  ;;  %s339_s13 = int_to_ptr.vmem [resolvable:$true] %s338_s13 }
  0x15   : > { %p1993_p3 = pnand %p1278_p0, %p325_p2  ;;  %s2240_s6 = sld [smem:[#allocation30_spill]] }
  0x16   : > { %s1885_s25 = smov [#allocation7]   ;;  %s1886_s30 = smov 128  }
  0x17   : > { %s336_s27 = sshll.u32 %s2236_s2, 4  ;;  %p1367_p4 = pneg %p1993_p3  ;;  %s337_s27 = int_to_ptr.hbm [resolvable:$true] %s336_s27 }
  0x18   : > { %s355_s26 = sshll.u32 %s1885_s25, 4  ;;  %s1887_s2 = smov 8   ;;  %s356_s26 = int_to_ptr.vmem [resolvable:$true] %s355_s26 }
  0x19   : > { %p2004_p5 = pnand %p1367_p4, %p53_p1  ;;  %s1888_s12 = smov [#allocation10]  }
  0x1a   : > { %s353_s16 = sshll.u32 %s2238_s4, 4  ;;  %s405_s4 = sshll.u32 %s2224_s8, 4  ;;  %s354_s16 = int_to_ptr.hbm [resolvable:$true] %s353_s16  ;;  %s406_s4 = int_to_ptr.hbm [resolvable:$true] %s405_s4 }
  0x1b   : > { %s379_s20 = sshll.u32 %s2240_s6, 4  ;;  %s381_s3 = sshll.u32 %s1888_s12, 4  ;;  %s380_s20 = int_to_ptr.hbm [resolvable:$true] %s379_s20  ;;  %s382_s3 = int_to_ptr.vmem [resolvable:$true] %s381_s3 }
  0x1c   : > { %1370 = dma.hbm_to_vmem [thread:$0]  (!%p2004_p5), %s337_s27, 512, %s339_s13, [#allocation5], %s1886_s30, %s1886_s30, %s1887_s2  }
  0x1d   : > { %1373 = dma.hbm_to_vmem [thread:$0]  (!%p2004_p5), %s354_s16, 512, %s356_s26, [#allocation8], %s1886_s30, %s1886_s30, %s1887_s2  }
  0x1e   : > { %1379 = dma.hbm_to_vmem [thread:$0]  (!%p2004_p5), %s380_s20, 512, %s382_s3, [#allocation11], %s1886_s30, %s1886_s30, %s1887_s2  }
  0x1f   : > { %s1889_s18 = smov [#allocation13]   ;;  %s432_s27 = sshll.u32 %s2226_s10, 4  ;;  %s433_s27 = int_to_ptr.hbm [resolvable:$true] %s432_s27 }
  0x20   : > { %s407_s19 = sshll.u32 %s1889_s18, 4  ;;  %s2241_s5 = sld [smem:[#allocation29_spill]]  ;;  %s408_s19 = int_to_ptr.vmem [resolvable:$true] %s407_s19 }
  0x21   : > { %1385 = dma.hbm_to_vmem [thread:$0]  (!%p2004_p5), %s406_s4, 512, %s408_s19, [#allocation14], %s1886_s30, %s1886_s30, %s1887_s2  }
  0x22   : > { %s1890_s12 = smov [#allocation16]   ;;  %s1891_s3 = smov [#allocation9]  }
  0x23   : > { %s434_s14 = sshll.u32 %s1890_s12, 4  ;;  %s370_s20 = sshll.u32 %s1891_s3, 4  ;;  %s435_s14 = int_to_ptr.vmem [resolvable:$true] %s434_s14  ;;  %s371_s20 = int_to_ptr.vmem [resolvable:$true] %s370_s20 }
  0x24   : > { %1391 = dma.hbm_to_vmem [thread:$0]  (!%p2004_p5), %s433_s27, 16, %s435_s14, [#allocation17]  }
  0x25   : > { %s2242_s7 = sld [smem:[#allocation31_spill]]  ;;  %s420_s30 = sshll.u32 %s2225_s9, 4  ;;  %s421_s30 = int_to_ptr.hbm [resolvable:$true] %s420_s30 }
  0x26   : > { %s368_s26 = sshll.u32 %s2241_s5, 4  ;;  %s1892_s19 = smov [#allocation12]   ;;  %s369_s26 = int_to_ptr.hbm [resolvable:$true] %s368_s26 }
  0x27   : > { %1376 = dma.hbm_to_vmem [thread:$0]  (!%p2004_p5), %s369_s26, 16, %s371_s20, [#allocation8]  }
  0x28   : > { %s396_s25 = sshll.u32 %s1892_s19, 4  ;;  %s1893_s27 = smov [#allocation15]   ;;  %s397_s25 = int_to_ptr.vmem [resolvable:$true] %s396_s25 }
  0x29   : > { %s422_s13 = sshll.u32 %s1893_s27, 4  ;;  %s444_s12 = sshll.u32 %s2227_s11, 4  ;;  %s423_s13 = int_to_ptr.vmem [resolvable:$true] %s422_s13  ;;  %s445_s12 = int_to_ptr.hbm [resolvable:$true] %s444_s12 }
  0x2a   : > { %1388 = dma.hbm_to_vmem [thread:$0]  (!%p2004_p5), %s421_s30, 16, %s423_s13, [#allocation14]  }
  0x2b   : > { %s394_s18 = sshll.u32 %s2242_s7, 4  ;;  %s1894_s14 = smov [#allocation18]   ;;  %s395_s18 = int_to_ptr.hbm [resolvable:$true] %s394_s18 }
  0x2c   : > { %1382 = dma.hbm_to_vmem [thread:$0]  (!%p2004_p5), %s395_s18, 16, %s397_s25, [#allocation11]  }
  0x2d   : > { %s446_s3 = sshll.u32 %s1894_s14, 4  ;;  %s2048_s20 = sadd.s32 1, %s1882_s24   ;;  %s447_s3 = int_to_ptr.vmem [resolvable:$true] %s446_s3 }
  0x2e   : > { %1394 = dma.hbm_to_vmem [thread:$0]  (!%p2004_p5), %s445_s12, 16, %s447_s3, [#allocation17]  }
  0x2f   : > { %s36_s6 = ssub.s32 %s1882_s24, %s2048_s20  ;;  %s39_s15 = sadd.s32 1, %s1878_s23 }
  0x30   : > { %p37_p6 = scmp.eq.s32.totalorder %s36_s6, 0  ;;  %p46_p7 = scmp.ne.s32.totalorder %s1878_s23, %s1874_s22 }
  0x31   : > { %p47_p8 = scmp.eq.s32.totalorder %s1882_s24, 0  ;;  %p52_p9 = scmp.ne.s32.totalorder %s1874_s22, %s1870_s21 }
  0x32   : > { %s2059_s18 = scalar_select %p37_p6, %s1878_s23, %s39_s15  }
  0x33   : > { %p48_p10 = por %p47_p8, %p46_p7  ;;  %p2063_p11 = por %p53_p1, %p52_p9 }
  0x34   : > { %p1411_p12 = scmp.lt.s32.totalorder %s1882_s24, 2  ;;  %s457_s17 = sand.u32 1, %s1878_s23  }
  0x35   : > { %s2069_s4 = sshll.u32 %s457_s17, 3  ;;  %s1290_s30 = sshll.u32 %s1882_s24, 3 }
  0x36   : > { %s465_s27 = scalar_lea.hbm %s2216_s0, %s1290_s30  ;;  %s461_s21 = scalar_lea.vmem [#allocation2], %s2069_s4 }
  0x37   : > { %s469_s13 = sshll.u32 %s461_s21, 4  ;;  %s467_s16 = sshll.u32 %s465_s27, 4  ;;  %s470_s13 = int_to_ptr.vmem [resolvable:$true] %s469_s13  ;;  %s468_s16 = int_to_ptr.hbm [resolvable:$true] %s467_s16 }
  0x38   : > { %p2076_p13 = pnand %p1411_p12, %p48_p10  ;;  %s484_s3 = scalar_lea.hbm %s2217_s1, %s1290_s30 }
  0x39   : > { %s476_s6 = sand.u32 1, %s1882_s24   ;;  %s458_s15 = scalar_lea.sflag [#allocation3], %s457_s17 }
  0x3a   : > { %s1764_s5 = sshra.s32 %s468_s16, 4  ;;  %p1768_p2 = pneg %p2076_p13  ;;  %s1765_s5 = int_to_ptr.hbm [resolvable:$true] %s1764_s5 }
  0x3b   : > { %s1766_s19 = scalar_lea.hbm %s1765_s5, 8  ;;  %s1771_s21 = scalar_lea.hbm %s2216_s0, 16 }
  0x3c   : > { %p1767_p0 = scmp.ne.s32.totalorder %s1765_s5, %s1766_s19  ;;  %p1772_p6 = scmp.lt.s32.totalorder %s1765_s5, %s2216_s0 }
  0x3d   : > { %p1773_p7 = scmp.lt.s32.totalorder %s1771_s21, %s1766_s19 }
  0x3e   : > { %p1769_p4 = pnand %p1768_p2, %p1767_p0 }
  0x3f   : > { %p1774_p8 = por %p1773_p7, %p1772_p6 }
  0x40   : > { %p1770_p5 = pneg %p1769_p4 }
  0x42   : > { %p1775_p9 = pnand %p1774_p8, %p1770_p5 }
  0x44   : > { %1778 = shalt.err (!%p1775_p9)
}
  0x45   : > { %1398 = dma.hbm_to_vmem [thread:$0]  (!%p2076_p13), %s468_s16, 128, %s470_s13, %s458_s15  }
  0x46   : > { %s486_s24 = sshll.u32 %s484_s3, 4  ;;  %s480_s17 = scalar_lea.vmem [#allocation4], %s2069_s4  ;;  %s487_s24 = int_to_ptr.hbm [resolvable:$true] %s486_s24 }
  0x47   : > { %s488_s30 = sshll.u32 %s480_s17, 4  ;;  %s477_s25 = scalar_lea.sflag [#allocation5], %s476_s6  ;;  %s489_s30 = int_to_ptr.vmem [resolvable:$true] %s488_s30 }
  0x48   : > { %s1794_s27 = sshra.s32 %s487_s24, 4  ;;  %s1801_s21 = scalar_lea.hbm %s2217_s1, 16  ;;  %s1795_s27 = int_to_ptr.hbm [resolvable:$true] %s1794_s27 }
  0x49   : > { %s1796_s7 = scalar_lea.hbm %s1795_s27, 8  ;;  %p1802_p4 = scmp.lt.s32.totalorder %s1795_s27, %s2217_s1 }
  0x4a   : > { %p1797_p10 = scmp.ne.s32.totalorder %s1795_s27, %s1796_s7  ;;  %p1803_p5 = scmp.lt.s32.totalorder %s1801_s21, %s1796_s7 }
  0x4c   : > { %p1799_p12 = pnand %p1797_p10, %p1768_p2  ;;  %p1804_p6 = por %p1803_p5, %p1802_p4 }
  0x4e   : > { %p1800_p0 = pneg %p1799_p12 }
  0x50   : > { %p1805_p7 = pnand %p1804_p6, %p1800_p0 }
  0x52   : > { %1808 = shalt.err (!%p1805_p7)
}
  0x53   : > { %1401 = dma.hbm_to_vmem [thread:$0]  (!%p2076_p13), %s487_s24, 128, %s489_s30, %s477_s25  }
  0x54   : > { %497 = sbr.rel (%p1993_p3) target bundleno = 1682 (0x692), region = 68  ;;  %s499_s4 = sand.u32 (!%p1993_p3), 1, %s1874_s22  }
  0x55   : > { %s2112_s16 = sshll.u32 (!%p1993_p3), %s499_s4, 3  ;;  %s500_s3 = scalar_lea.sflag (!%p1993_p3), [#allocation3], %s499_s4 }
  0x56   : > { %s503_s6 = scalar_lea.vmem (!%p1993_p3), [#allocation2], %s2112_s16 }
  0x59   : > { %1841 = dma.done.wait (%p2063_p11), %s500_s3, 128  }
  0x5a   : > { %1843 = vsyncadd (%p2063_p11), %s500_s3, 4294967168  ;;  %s509_s7 = sand.u32 1, %s1988_s28   ;;  %s513_s29 = scalar_lea.vmem [#allocation4], %s2112_s16 }
  0x5b   : > { %s510_s26 = scalar_lea.sflag [#allocation5], %s509_s7 }
  0x5c   : > { %1845 = dma.done.wait (%p2063_p11), %s510_s26, 128  }
  0x5d   : > { %1847 = vsyncadd (%p2063_p11), %s510_s26, 4294967168 }
  0x5e   : > { %1849 = dma.done.wait (%p53_p1), [#allocation5], 512  }
  0x5f   : > { %1851 = vsyncadd (%p53_p1), [#allocation5], 4294966784 }
  0x60   : > { %1853 = dma.done.wait (%p53_p1), [#allocation8], 528  }
  0x61   : > { %1855 = vsyncadd (%p53_p1), [#allocation8], 4294966768 }
  0x62   : > { %1857 = dma.done.wait (%p53_p1), [#allocation11], 528  }
  0x63   : > { %1859 = vsyncadd (%p53_p1), [#allocation11], 4294966768 }
  0x64   : > { %1861 = dma.done.wait (%p53_p1), [#allocation14], 528  }
  0x65   : > { %1863 = vsyncadd (%p53_p1), [#allocation14], 4294966768 }
  0x66   : > { %1865 = dma.done.wait (%p53_p1), [#allocation17], 32  }
  0x67   : > { %1867 = vsyncadd (%p53_p1), [#allocation17], 4294967264  ;;  %v649_v0 = vld [vmem:[#allocation7 + $0x18] sm:$0xff]  ;;  %v648_v2 = vld [vmem:[#allocation7 + $0x10] sm:$0xff]  ;;  %vm621_vm0 = vcmask 261120   ;;  %s2245_s14 = sld [smem:[#allocation27_spill]] }
  0x68   : > { %v616_v1 = vld [vmem:[#allocation6 + $0x18] sm:$0xff]  ;;  %666 = vmatpush.msra.mxu1 %v649_v0  ;;  %v615_v3 = vld [vmem:[#allocation6 + $0x10] sm:$0xff]  ;;  %v647_v4 = vld [vmem:[#allocation7 + $0x8] sm:$0xff]  ;;  %vm709_vm1 = vcmask 64512   ;;  %s1895_s24 = smov 112   ;;  %s1896_s17 = smov 120  }
  0x69   : > { %637 = vmatpush.msra.mxu0 %v616_v1  ;;  %v614_v5 = vld [vmem:[#allocation6 + $0x8] sm:$0xff]  ;;  %v646_v6 = vld [vmem:[#allocation7] sm:$0xff]  ;;  %v611_v9 = vld [vmem:[%s513_s29] sm:$0xff]  ;;  %s1897_s30 = smov 104   ;;  %p604_p1 = scmp.lt.s32.totalorder %s1988_s28, 1 }
  0x6a   : > { %v2145_v7 = vld [vmem:[%s503_s6] sm:$0xff]  ;;  %667 = vmatpush.msra.mxu1 %v648_v2  ;;  %v676_v19 = vld [vmem:[#allocation10 + $0x10] sm:$0xff]  ;;  %s2246_s19 = sld [smem:[#allocation32_spill]] }
  0x6b   : > { %638 = vmatpush.msra.mxu0 %v615_v3  ;;  %v613_v8 = vld [vmem:[#allocation6] sm:$0xff]  ;;  %v612_v10 = vadd.f32 %v611_v9, %v2145_v7  ;;  %v675_v25 = vld [vmem:[#allocation10 + $0x8] sm:$0xff]  ;;  %s2252_s28 = smov (!%p604_p1, %s1988_s28), 1 }
  0x6c   : > { %668 = vmatpush.msra.mxu1 %v647_v4  ;;  %v1468_v11 = vld [vmem:[#allocation9] ss:$0 sm:$0xff]  ;;  %v674_v26 = vld [vmem:[#allocation10] sm:$0xff]  ;;  %v706_v0 = vld [vmem:[#allocation13 + $0x8] sm:$0xff]  ;;  %s1305_s25 = sshll.u32 %s2252_s28, 3 }
  0x6d   : > { %639 = vmatpush.msra.mxu0 %v614_v5  ;;  %v1469_v12 = vld [vmem:[%s2245_s14] ss:$0 sm:$0xff]  ;;  %v1470_v34 = vld [vmem:[#allocation12] ss:$0 sm:$0xff]  ;;  %v705_v37 = vld [vmem:[#allocation13] sm:$0xff] }
  0x6e   : > { %669 = vmatpush.msra.mxu1 %v646_v6  ;;  %v677_v18 = vld [vmem:[#allocation10 + $0x18] sm:$0xff] }
  0x6f   : > { %640 = vmatpush.msra.mxu0 %v613_v8  ;;  %1307 = vmatmul.msk.f32.vlgmr.msra.gmra.mxu1 %vm621_vm0, %v612_v10 }
  0x70   : > { %1306 = vmatmul.msk.f32.vlgmr.msra.gmra.mxu0 %vm621_vm0, %v612_v10  ;;  %697 = vmatpush.msra.mxu2 %v677_v18  ;;  %v708_v18 = vld [vmem:[#allocation13 + $0x18] sm:$0xff]  ;;  %s607_s21 = scalar_lea.vmem %s2246_s19, %s1305_s25 }
  0x72   : > { %698 = vmatpush.msra.mxu2 %v676_v19 }
  0x74   : > { %699 = vmatpush.msra.mxu2 %v675_v25 }
  0x76   : > { %700 = vmatpush.msra.mxu2 %v674_v26  ;;  %v1471_v26 = vld [vmem:[#allocation15] ss:$0 sm:$0xff] }
  0x77   : > { %1308 = vmatmul.msk.f32.vlgmr.msra.gmra.mxu2 %vm621_vm0, %v2145_v7 }
  0x78   : > { %854 = vmatpush.msrb.mxu2 %v706_v0 }
  0xec   : > { %v671_v13 = vpop.f32.mrf.mxu1 }
  0xed   : > { %v642_v14 = vpop.f32.mrf.mxu0  ;;  %v672_v15 = vadd.f32 %v1468_v11, %v671_v13 }
  0xee   : > { %v643_v16 = vadd.f32 %v1469_v12, %v642_v14  ;;  %v707_v12 = vld [vmem:[#allocation13 + $0x10] sm:$0xff] }
  0xef   : > { %884 = vrot.lane.b32.xlu2 %v672_v15, %s1895_s24  ;;  %772 = vrot.lane.b32.xlu1 %v672_v15, %s1896_s17 }
  0xf0   : > { %v645_v17 = vmul.f32 0.35355338, %v643_v16  ;;  %1309 = vmatpush.xpose.msk.msra.mxu3 %vm709_vm1, %v672_v15  ;;  %965 = vmatpush.msra.mxu2 %v707_v12 }
  0xf3   : > { %1310 = vmatmul.msk.f32.vlgmr.msra.gmra.mxu3 %vm709_vm1, %v645_v17 }
  0xf7   : > { %973 = vrot.lane.b32.xlu2 %v672_v15, %s1897_s30  ;;  %770 = vrot.lane.b32.xlu1 %v645_v17, %s1896_s17 }
  0xfa   : > { %v702_v35 = vpop.f32.mrf.mxu2 }
  0xfb   : > { %v2169_v36 = vadd.f32 %v1470_v34, %v702_v35 }
  0xfd   : > { %765 = vmatpush.msrb.mxu3 %v2169_v36 }
  0xff   : > { %971 = vrot.lane.b32.xlu1 %v645_v17, %s1897_s30  ;;  %877 = vmatpush.msra.mxu3 %v705_v37 }
 0x149   : > { %v885_v21 = vpop.permute.xlu2 %884 }
 0x151   : > { %v974_v38 = vpop.permute.xlu2 %973 }
 0x161   : > { %v773_v20 = vpop.permute.xlu1 %772 }
 0x162   : > { %1312 = vmatpush.xpose.msk.msrb.mxu0 %vm709_vm1, %v773_v20 }
 0x166   : > { %1317 = vmatpush.xpose.msk.msra.mxu0 %vm709_vm1, %v885_v21 }
 0x169   : > { %v771_v22 = vpop.permute.xlu1 %770 }
 0x16a   : > { %1313 = vmatmul.msk.f32.vlgmr.msrb.gmra.mxu0 %vm709_vm1, %v771_v22 }
 0x171   : > { %v972_v51 = vpop.permute.xlu1 %971 }
 0x176   : > { %v733_v23 = vpop.f32.mrf.mxu3 }
 0x177   : > { %v736_v24 = vsel %vm709_vm1, %v733_v23, -inf }
 0x178   : > { %737 = vmax.xlane.f32.xlu0 %v736_v24 }
 0x1e7   : > { %v795_v27 = vpop.f32.mrf.mxu0 }
 0x1e8   : > { %v798_v28 = vsel %vm709_vm1, %v795_v27, -inf }
 0x1e9   : > { %799 = vmax.xlane.f32.xlu2 %v798_v28 }
 0x1eb   : > { %v738_v29 = vpop.xlane.xlu0 %737 }
 0x1ec   : > { %v739_v30 = vsub.f32 %v733_v23, %v738_v29 }
 0x1ee   : > { %v740_v31 = vmul.f32 1.442695, %v739_v30  ;;  %v1898_v30 = vmov 32.0  }
 0x1f0   : > { %1474 = vpow2.f32 %v740_v31 }
 0x1f6   : > { %v1475_v32 = vpop.eup %1474 }
 0x1f7   : > { %v742_v33 = vsel %vm709_vm1, %v1475_v32, 0.0 }
 0x1f8   : > { %743 = vadd.xlane.f32.xlu0 %v742_v33 }
 0x20c   : > { %882 = vrot.lane.b32.xlu0 %v645_v17, %s1895_s24 }
 0x25c   : > { %v800_v39 = vpop.xlane.xlu2 %799 }
 0x25d   : > { %v801_v40 = vsub.f32 %v795_v27, %v800_v39 }
 0x25f   : > { %v802_v41 = vmul.f32 1.442695, %v801_v40 }
 0x261   : > { %1476 = vpow2.f32 %v802_v41 }
 0x267   : > { %v1477_v42 = vpop.eup %1476 }
 0x268   : > { %v804_v43 = vsel %vm709_vm1, %v1477_v42, 0.0 }
 0x269   : > { %805 = vadd.xlane.f32.xlu2 %v804_v43 }
 0x26b   : > { %v744_v44 = vpop.xlane.xlu0 %743 }
 0x26c   : > { %1478 = vrcp.f32 %v744_v44 }
 0x272   : > { %v1479_v45 = vpop.eup %1478 }
 0x273   : > { %v746_v46 = vmul.f32 %v1479_v45, %v1475_v32 }
 0x275   : > { %1311 = vmatmul.msk.f32.vlgmr.msrb.gmra.mxu3 %vm709_vm1, %v746_v46 }
 0x276   : > { %1321 = vmatpush.xpose.msk.msrb.mxu3 %vm709_vm1, %v974_v38 }
 0x27e   : > { %v883_v47 = vpop.permute.xlu0 %882 }
 0x27f   : > { %1318 = vmatmul.msk.f32.vlgmr.msra.gmra.mxu0 %vm709_vm1, %v883_v47 }
 0x2dc   : > { %v806_v57 = vpop.xlane.xlu2 %805 }
 0x2f8   : > { %v767_v48 = vpop.f32.mrf.mxu3 }
 0x2f9   : > { %1316 = vmatmul.msk.f32.vlgmr.msra.gmra.mxu3 %vm709_vm1, %v767_v48 }
 0x2fc   : > { %v907_v49 = vpop.f32.mrf.mxu0 }
 0x2fd   : > { %v910_v50 = vsel %vm709_vm1, %v907_v49, -inf }
 0x2fe   : > { %911 = vmax.xlane.f32.xlu1 %v910_v50  ;;  %v1472_v50 = vld [vmem:[#allocation16] ss:$0 sm:$0xff] }
 0x301   : > { %1322 = vmatmul.msk.f32.vlgmr.msrb.gmra.mxu3 %vm709_vm1, %v972_v51 }
 0x317   : > { %810 = vrot.lane.b32.xlu1 %v2169_v36, %s1896_s17 }
 0x371   : > { %v912_v52 = vpop.xlane.xlu1 %911 }
 0x372   : > { %v913_v53 = vsub.f32 %v907_v49, %v912_v52  ;;  %v1473_v52 = vld [vmem:[#allocation18] ss:$0 sm:$0xff] }
 0x374   : > { %v914_v54 = vmul.f32 1.442695, %v913_v53 }
 0x376   : > { %1480 = vpow2.f32 %v914_v54 }
 0x377   : > { %1482 = vrcp.f32 %v806_v57 }
 0x37c   : > { %v1481_v55 = vpop.eup %1480  ;;  %v879_v56 = vpop.f32.mrf.mxu3 }
 0x37d   : > { %v916_v58 = vsel %vm709_vm1, %v1481_v55, 0.0  ;;  %v1483_v61 = vpop.eup %1482 }
 0x37e   : > { %917 = vadd.xlane.f32.xlu2 %v916_v58  ;;  %v808_v63 = vmul.f32 %v1483_v61, %v1477_v42 }
 0x384   : > { %v996_v59 = vpop.f32.mrf.mxu3 }
 0x385   : > { %v999_v60 = vsel %vm709_vm1, %v996_v59, -inf }
 0x386   : > { %1000 = vmax.xlane.f32.xlu0 %v999_v60 }
 0x389   : > { %v811_v62 = vpop.permute.xlu1 %810 }
 0x38a   : > { %831 = vmatpush.msrb.mxu1 %v811_v62 }
 0x38b   : > { %1314 = vmatmul.msk.f32.vlgmr.msrb.gmra.mxu1 %vm709_vm1, %v808_v63 }
 0x39a   : > { %921 = vrot.lane.b32.xlu0 %v2169_v36, %s1895_s24 }
 0x3f1   : > { %v918_v4 = vpop.xlane.xlu2 %917 }
 0x3f9   : > { %v1001_v1 = vpop.xlane.xlu0 %1000 }
 0x3fa   : > { %v1002_v2 = vsub.f32 %v996_v59, %v1001_v1 }
 0x3fc   : > { %v1003_v3 = vmul.f32 1.442695, %v1002_v2 }
 0x3fe   : > { %1484 = vpow2.f32 %v1003_v3 }
 0x3ff   : > { %1486 = vrcp.f32 %v918_v4 }
 0x404   : > { %v1485_v5 = vpop.eup %1484 }
 0x405   : > { %v1005_v6 = vsel %vm709_vm1, %v1485_v5, 0.0  ;;  %v1487_v9 = vpop.eup %1486 }
 0x406   : > { %1006 = vadd.xlane.f32.xlu2 %v1005_v6  ;;  %v920_v10 = vmul.f32 %v1487_v9, %v1481_v55 }
 0x408   : > { %v833_v8 = vpop.f32.mrf.mxu1 }
 0x409   : > { %1315 = vmatmul.msk.f32.vlgmr.msrb.gmra.mxu2 %vm709_vm1, %v833_v8 }
 0x40c   : > { %v922_v11 = vpop.permute.xlu0 %921 }
 0x40d   : > { %942 = vmatpush.msra.mxu1 %v922_v11 }
 0x40e   : > { %1319 = vmatmul.msk.f32.vlgmr.msra.gmra.mxu1 %vm709_vm1, %v920_v10 }
 0x40f   : > { %1054 = vmatpush.msrb.mxu1 %v708_v18 }
 0x41e   : > { %1010 = vrot.lane.b32.xlu2 %v2169_v36, %s1897_s30 }
 0x479   : > { %v1007_v13 = vpop.xlane.xlu2 %1006 }
 0x47a   : > { %1488 = vrcp.f32 %v1007_v13 }
 0x47b   : > { %1490 = vrcp.f32 %v1898_v30 }
 0x480   : > { %v1489_v14 = vpop.eup %1488 }
 0x481   : > { %v1009_v15 = vmul.f32 %v1489_v14, %v1485_v5  ;;  %v1011_v16 = vpop.permute.xlu2 %1010  ;;  %v1491_v31 = vpop.eup %1490 }
 0x482   : > { %1031 = vmatpush.msrb.mxu0 %v1011_v16  ;;  %v1070_v32 = vmul.f32 32.0, %v1491_v31  ;;  %vm1074_vm2 = vweird.f32 %v1491_v31 }
 0x483   : > { %1323 = vmatmul.msk.f32.vlgmr.msrb.gmra.mxu0 %vm709_vm1, %v1009_v15 }
 0x484   : > { %v1071_v33 = vsub.f32 1.0, %v1070_v32 }
 0x486   : > { %v1072_v34 = vmul.f32 %v1491_v31, %v1071_v33 }
 0x488   : > { %v1073_v35 = vadd.f32 %v1491_v31, %v1072_v34 }
 0x48a   : > { %v1075_v36 = vsel %vm1074_vm2, %v1491_v31, %v1073_v35 }
 0x48b   : > { %v944_v17 = vpop.f32.mrf.mxu1 }
 0x48c   : > { %1320 = vmatmul.msk.f32.vlgmr.msra.gmra.mxu2 %vm709_vm1, %v944_v17  ;;  %v856_v20 = vpop.f32.mrf.mxu2 }
 0x48d   : > { %v880_v22 = vadd.f32 %v879_v56, %v856_v20 }
 0x500   : > { %v1033_v19 = vpop.f32.mrf.mxu0 }
 0x501   : > { %1324 = vmatmul.msk.f32.vlgmr.msrb.gmra.mxu1 %vm709_vm1, %v1033_v19 }
 0x50f   : > { %v967_v21 = vpop.f32.mrf.mxu2 }
 0x510   : > { %v970_v23 = vadd.f32 %v967_v21, %v880_v22 }
 0x57e   : > { %v1056_v24 = vpop.f32.mrf.mxu1 }
 0x57f   : > { %v1059_v25 = vadd.f32 %v1056_v24, %v970_v23 }
 0x581   : > { %v1060_v27 = vadd.f32 %v1059_v25, %v2145_v7 }
 0x583   : > { %v1065_v28 = vadd.f32 %v1471_v26, %v1060_v27 }
 0x585   : > { %v1066_v29 = vsel %vm621_vm0, %v1065_v28, 0.0 }
 0x586   : > { %1067 = vadd.xlane.f32.xlu1 %v1066_v29 }
 0x5f9   : > { %v1068_v37 = vpop.xlane.xlu1 %1067 }
 0x5fa   : > { %v1076_v38 = vmul.f32 %v1075_v36, %v1068_v37 }
 0x5fc   : > { %v1077_v39 = vsub.f32 %v1065_v28, %v1076_v38 }
 0x5fe   : > { %v1078_v40 = vmul.f32 %v1077_v39, %v1077_v39 }
 0x600   : > { %v1079_v7 = vsel %vm621_vm0, %v1078_v40, 0.0 }
 0x601   : > { %1080 = vadd.xlane.f32.xlu0 %v1079_v7 }
 0x674   : > { %v1081_v41 = vpop.xlane.xlu0 %1080 }
 0x675   : > { %v1082_v42 = vmul.f32 %v1081_v41, %v1075_v36 }
 0x677   : > { %v1083_v43 = vadd.f32 1e-05, %v1082_v42 }
 0x679   : > { %1492 = vrsqrt.f32 %v1083_v43  ;;  %vm1090_vm4 = vweird.f32 %v1083_v43 }
 0x67f   : > { %v1493_v44 = vpop.eup %1492 }
 0x680   : > { %v1085_v45 = vmul.f32 %v1493_v44, %v1083_v43  ;;  %vm1091_vm3 = vweird.f32 %v1493_v44 }
 0x681   : > { %vm1092_vm5 = vmor %vm1090_vm4, %vm1091_vm3 }
 0x682   : > { %v1086_v46 = vmul.f32 %v1493_v44, %v1085_v45 }
 0x684   : > { %v1087_v47 = vmul.f32 0.5, %v1086_v46 }
 0x686   : > { %v1088_v48 = vsub.f32 1.5, %v1087_v47 }
 0x688   : > { %v1089_v49 = vmul.f32 %v1493_v44, %v1088_v48 }
 0x68a   : > { %v1093_v51 = vsel %vm1092_vm5, %v1493_v44, %v1089_v49 }
 0x68b   : > { %v1094_v53 = vmul.f32 %v1093_v51, %v1077_v39 }
 0x68d   : > { %v1098_v54 = vmul.f32 %v1472_v50, %v1094_v53 }
 0x68f   : > { %v1102_v55 = vadd.f32 %v1473_v52, %v1098_v54 }
 0x691   : > { %1103 = vst.msk [vmem:[%s607_s21] sm:$0xff] %vm621_vm0, %v1102_v55 }
 0x692 PF: > { %p29_p3 = scmp.ge.s32.totalorder %s2048_s20, 4   ;;  %s2247_s21 = smov %s1874_s22 }
 0x693   : > { %s2248_s22 = smov %s1878_s23  ;;  %s2249_s23 = smov %s2059_s18 }
 0x694   : > { %s2250_s24 = smov %s2048_s20  ;;  %31 = sbr.rel (!%p29_p3) target bundleno = 17 (0x11), region = 157 }
 0x699   :  { %1123 = vsyncpa [#allocation3], 1 }
 0x69a   :  { %1125 = vsyncpa [#allocation3 + $0x1], 1 }
 0x69b   :  { %1126 = vsyncpa [#allocation5], 1 }
 0x69c   :  { %1128 = vsyncpa [#allocation5 + $0x1], 1 }
 0x69d   :  { %1129 = vsyncpa [#allocation8], 1 }
 0x69e   :  { %1130 = vsyncpa [#allocation11], 1 }
 0x69f   :  { %1131 = vsyncpa [#allocation14], 1 }
 0x6a0   :  { %1132 = vsyncpa [#allocation17], 1 }

// kernel: transformer_decoder_layer.4
= control target key start
LH: loop header
LB: loop body
LE: loop exit
PB: predicated region body
PF: predicated region fallthrough
CT: control target
= control target key end

     0   :  { %s2046_s0 = inlined_call_operand.vmem [shape: f32[2,8,32], index: 0, kind: input, shape index: {}]   ;;  %s2047_s1 = inlined_call_operand.vmem [shape: f32[2,8,32], index: 1, kind: input, shape index: {}]   ;;  %s2048_s2 = inlined_call_operand.vmem [shape: f32[2,12,32], index: 2, kind: input, shape index: {}]   ;;  %s2049_s3 = inlined_call_operand.hbm [shape: f32[32,32], index: 3, kind: input, shape index: {}]   ;;  %s2050_s4 = inlined_call_operand.vmem [shape: f32[1,32], index: 4, kind: input, shape index: {}]   ;;  %s2051_s5 = inlined_call_operand.hbm [shape: f32[32,32], index: 5, kind: input, shape index: {}]   ;;  %s2052_s6 = inlined_call_operand.vmem [shape: f32[1,32], index: 6, kind: input, shape index: {}]   ;;  %s2053_s7 = inlined_call_operand.hbm [shape: f32[32,32], index: 7, kind: input, shape index: {}]   ;;  %s2054_s8 = inlined_call_operand.vmem [shape: f32[1,32], index: 8, kind: input, shape index: {}]   ;;  %s2055_s9 = inlined_call_operand.hbm [shape: f32[32,32], index: 9, kind: input, shape index: {}]   ;;  %s2056_s10 = inlined_call_operand.vmem [shape: f32[1,32], index: 10, kind: input, shape index: {}]   ;;  %s2057_s11 = inlined_call_operand.vmem [shape: f32[1,32], index: 11, kind: input, shape index: {}]   ;;  %s2058_s12 = inlined_call_operand.vmem [shape: f32[1,32], index: 12, kind: input, shape index: {}]   ;;  %s2059_s13 = inlined_call_operand.vmem [shape: f32[2,8,32], index: 13, kind: output, shape index: {0}]   ;;  %s2060_s14 = inlined_call_operand.hbm [shape: f32[2,8,12], index: 14, kind: output, shape index: {1}]  }
   0x1   :  { %2067 = sst [smem:[#allocation21_spill]] %s2049_s3 }
   0x2   :  { %2068 = sst [smem:[#allocation22_spill]] %s2051_s5 }
   0x3   :  { %2069 = sst [smem:[#allocation23_spill]] %s2058_s12 }
   0x4   :  { %2070 = sst [smem:[#allocation24_spill]] %s2059_s13 }
   0x5   :  { %20 = vsyncpa [#allocation3], 0 }
   0x6   :  { %21 = vsyncpa [#allocation6], 0 }
   0x7   :  { %22 = vsyncpa [#allocation9], 0 }
   0x8   :  { %23 = vsyncpa [#allocation4], 0 }
   0x9   :  { %25 = vsyncpa [#allocation4 + $0x1], 0  ;;  %s1790_s29 = smov 0   ;;  %s1792_s30 = smov 0  }
   0xa   :  { %s1794_s15 = smov 0   ;;  %s1796_s16 = smov 0  }
   0xb LB: > { %2071 = sst [smem:[#allocation15_spill]] %s1691_s29  ;;  %s1811_s17 = sadd.s32 4294967295, %s1703_s16   ;;  %s1703_s16 = sphi %s1796_s16, %s2088_s16   ;;  %s1699_s15 = sphi %s1794_s15, %s2090_s15   ;;  %s1695_s30 = sphi %s1792_s30, %s2092_s30   ;;  %s1691_s29 = sphi %s1790_s29, %s2091_s29  }
   0xc   : > { %2072 = sst [smem:[#allocation16_spill]] %s1699_s15  ;;  %s1345_s18 = sadd.s32 4294967294, %s1703_s16  }
   0xd   : > { %2073 = sst [smem:[#allocation17_spill]] %s1703_s16  ;;  %s1815_s19 = sadd.s32 1, %s1703_s16  }
   0xe   : > { %2074 = sst [smem:[#allocation18_spill]] %s1815_s19  ;;  %s352_s20 = sadd.s32 1, %s1699_s15 }
   0xf   : > { %s349_s21 = ssub.s32 %s1703_s16, %s1815_s19  ;;  %p362_p0 = scmp.ne.s32.totalorder %s1699_s15, %s1695_s30 }
  0x10   : > { %p350_p1 = scmp.eq.s32.totalorder %s349_s21, 0  ;;  %p363_p2 = scmp.eq.s32.totalorder %s1811_s17, 1 }
  0x11   : > { %p368_p3 = scmp.ne.s32.totalorder %s1695_s30, %s1691_s29  ;;  %p369_p4 = scmp.eq.s32.totalorder %s1345_s18, 1 }
  0x12   : > { %s1826_s22 = scalar_select %p350_p1, %s1699_s15, %s352_s20  }
  0x13   : > { %p1828_p5 = por %p363_p2, %p362_p0  ;;  %p1832_p6 = por %p369_p4, %p368_p3 }
  0x14   : > { %2075 = sst [smem:[#allocation19_spill]] %s1826_s22  ;;  %p1346_p7 = scmp.ge.s32.totalorder %s1703_s16, 1 }
  0x15   : > { %s2077_s24 = scalar_select %p1832_p6, 1, 0 }
  0x16   : > { %p376_p8 = scmp.lt.s32.totalorder %s1703_s16, 3  ;;  %p1432_p9 = scmp.eq.s32.totalorder %s1811_s17, 0 }
  0x17   : > { %2078 = sst [smem:[#allocation20_spill]] %s2077_s24  ;;  %s1705_s15 = smov [#allocation5]  }
  0x18   : > { %p1839_p10 = pnand %p1346_p7, %p376_p8  ;;  %s2080_s5 = sld [smem:[#allocation22_spill]] }
  0x19   : > { %s2081_s3 = sld [smem:[#allocation21_spill]]  ;;  %s406_s19 = sshll.u32 %s1705_s15, 4  ;;  %s407_s19 = int_to_ptr.vmem [resolvable:$true] %s406_s19 }
  0x1a   : > { %p1415_p11 = pneg %p1839_p10  ;;  %s1706_s26 = smov 128  }
  0x1b   : > { %s1707_s27 = smov 8   ;;  %s421_s24 = sshll.u32 %s2053_s7, 4  ;;  %s422_s24 = int_to_ptr.hbm [resolvable:$true] %s421_s24 }
  0x1c   : > { %p1853_p12 = pnand %p1432_p9, %p1415_p11  ;;  %s438_s16 = sshll.u32 %s2055_s9, 4  ;;  %s439_s16 = int_to_ptr.hbm [resolvable:$true] %s438_s16 }
  0x1d   : > { %s1709_s13 = smov [#allocation7]  }
  0x1e   : > { %s404_s28 = sshll.u32 %s2080_s5, 4  ;;  %s1708_s5 = smov [#allocation2]   ;;  %s405_s28 = int_to_ptr.hbm [resolvable:$true] %s404_s28 }
  0x1f   : > { %s387_s21 = sshll.u32 %s2081_s3, 4  ;;  %s389_s18 = sshll.u32 %s1708_s5, 4  ;;  %s388_s21 = int_to_ptr.hbm [resolvable:$true] %s387_s21  ;;  %s390_s18 = int_to_ptr.vmem [resolvable:$true] %s389_s18 }
  0x20   : > { %1421 = dma.hbm_to_vmem [thread:$0]  (!%p1853_p12), %s405_s28, 512, %s407_s19, [#allocation6], %s1706_s26, %s1706_s26, %s1707_s27  }
  0x21   : > { %1418 = dma.hbm_to_vmem [thread:$0]  (!%p1853_p12), %s388_s21, 512, %s390_s18, [#allocation3], %s1706_s26, %s1706_s26, %s1707_s27  }
  0x22   : > { %s423_s12 = sshll.u32 %s1709_s13, 4  ;;  %s1710_s19 = smov [#allocation8]   ;;  %s424_s12 = int_to_ptr.vmem [resolvable:$true] %s423_s12 }
  0x23   : > { %1424 = dma.hbm_to_vmem [thread:$0]  (!%p1853_p12), %s422_s24, 512, %s424_s12, [#allocation6], %s1706_s26, %s1706_s26, %s1707_s27  }
  0x24   : > { %s440_s5 = sshll.u32 %s1710_s19, 4  ;;  %487 = sbr.rel (%p1839_p10) target bundleno = 1659 (0x67b), region = 72  ;;  %s441_s5 = int_to_ptr.vmem [resolvable:$true] %s440_s5 }
  0x25   : > { %1427 = dma.hbm_to_vmem [thread:$0]  (!%p1853_p12), %s439_s16, 512, %s441_s5, [#allocation9], %s1706_s26, %s1706_s26, %s1707_s27  }
  0x29   : > { %1674 = dma.done.wait (%p1432_p9), [#allocation3], 512  }
  0x2a   : > { %1676 = vsyncadd (%p1432_p9), [#allocation3], 4294966784 }
  0x2b   : > { %1678 = dma.done.wait (%p1432_p9), [#allocation6], 1024  }
  0x2c   : > { %1680 = vsyncadd (%p1432_p9), [#allocation6], 4294966272 }
  0x2d   : > { %1682 = dma.done.wait (%p1432_p9), [#allocation9], 512  }
  0x2e   : > { %1684 = vsyncadd (%p1432_p9), [#allocation9], 4294966784  ;;  %p561_p13 = scmp.lt.s32.totalorder %s1811_s17, 1  ;;  %v621_v0 = vld [vmem:[#allocation5 + $0x18] sm:$0xff]  ;;  %v620_v1 = vld [vmem:[#allocation5 + $0x10] sm:$0xff]  ;;  %vm593_vm0 = vcmask 261120  }
  0x2f   : > { %644 = vmatpush.msra.mxu1 %v621_v0  ;;  %v588_v2 = vld [vmem:[#allocation2 + $0x18] sm:$0xff]  ;;  %v619_v3 = vld [vmem:[#allocation5 + $0x8] sm:$0xff]  ;;  %v618_v4 = vld [vmem:[#allocation5] sm:$0xff]  ;;  %vm690_vm1 = vcmask 64512   ;;  %s1711_s5 = smov 104   ;;  %vm720_vm2 = vcmask 97280  }
  0x30   : > { %s562_s3 = scalar_select %p561_p13, %s1811_s17, 1  ;;  %609 = vmatpush.msra.mxu0 %v588_v2  ;;  %v587_v5 = vld [vmem:[#allocation2 + $0x10] sm:$0xff]  ;;  %v586_v7 = vld [vmem:[#allocation2 + $0x8] sm:$0xff]  ;;  %v585_v10 = vld [vmem:[#allocation2] sm:$0xff]  ;;  %vm748_vm3 = vcmask 1043456  }
  0x31   : > { %645 = vmatpush.msra.mxu1 %v620_v1  ;;  %v658_v14 = vld [vmem:[#allocation7 + $0x18] sm:$0xff]  ;;  %v657_v15 = vld [vmem:[#allocation7 + $0x10] sm:$0xff]  ;;  %v656_v16 = vld [vmem:[#allocation7 + $0x8] sm:$0xff]  ;;  %s1393_s26 = sshll.u32 %s1811_s17, 3  ;;  %s1649_s16 = scalar_lea.hbm %s2060_s14, 16 }
  0x32   : > { %s1887_s12 = sshll.u32 %s562_s3, 3  ;;  %s1396_s13 = sshll.u32 %s562_s3, 4  ;;  %610 = vmatpush.msra.mxu0 %v587_v5  ;;  %675 = vmatpush.msra.mxu2 %v658_v14  ;;  %v1483_v17 = vld [vmem:[%s2052_s6] ss:$0 sm:$0xff] }
  0x33   : > { %s573_s22 = scalar_lea.vmem %s2048_s2, %s1396_s13  ;;  %s564_s28 = scalar_lea.vmem %s2046_s0, %s1887_s12  ;;  %646 = vmatpush.msra.mxu1 %v619_v3  ;;  %v1484_v18 = vld [vmem:[%s2050_s4] ss:$0 sm:$0xff] }
  0x34   : > { %s568_s27 = scalar_lea.vmem %s2047_s1, %s1887_s12  ;;  %v583_v6 = vld [vmem:[%s573_s22] sm:$0xff]  ;;  %611 = vmatpush.msra.mxu0 %v586_v7  ;;  %v584_v12 = vld [vmem:[%s573_s22 + $0x8] sm:$0xf]  ;;  %676 = vmatpush.msra.mxu2 %v657_v15  ;;  %s1712_s3 = smov 120  }
  0x35   : > { %v1900_v8 = vld [vmem:[%s564_s28] sm:$0xff]  ;;  %647 = vmatpush.msra.mxu1 %v618_v4  ;;  %s1713_s13 = smov 112   ;;  %s558_s22 = sand.u32 1, %s1695_s30  }
  0x36   : > { %v581_v9 = vld [vmem:[%s568_s27] sm:$0xff]  ;;  %1364 = vmatmul.msk.f32.vlgmr.msra.gmra.mxu1 %vm593_vm0, %v583_v6  ;;  %612 = vmatpush.msra.mxu0 %v585_v10  ;;  %s1982_s24 = sshll.u32 %s558_s22, 3  ;;  %s1192_s20 = scalar_lea.hbm %s2060_s14, %s1393_s26 }
  0x37   : > { %v582_v11 = vadd.f32 %v581_v9, %v1900_v8  ;;  %677 = vmatpush.msra.mxu2 %v656_v16  ;;  %v655_v22 = vld [vmem:[#allocation7] sm:$0xff]  ;;  %s560_s25 = scalar_lea.vmem [#allocation10], %s1982_s24  ;;  %s1196_s19 = sshll.u32 %s1192_s20, 4  ;;  %s1197_s19 = int_to_ptr.hbm [resolvable:$true] %s1196_s19 }
  0x38   : > { %v686_v23 = vld [vmem:[#allocation8] sm:$0xff]  ;;  %s1194_s15 = sshll.u32 %s560_s25, 4  ;;  %s1195_s15 = int_to_ptr.vmem [resolvable:$true] %s1194_s15 }
  0x39   : > { %1363 = vmatmul.msk.f32.vlgmr.msra.gmra.mxu0 %vm593_vm0, %v582_v11  ;;  %678 = vmatpush.msra.mxu2 %v655_v22  ;;  %v1485_v41 = vld [vmem:[%s2054_s8] ss:$0 sm:$0xff] }
  0x3a   : > { %1366 = vmatmul.msk.f32.vlgmr.msra.gmra.mxu2 %vm593_vm0, %v583_v6 }
  0x3b   : > { %900 = vmatpush.msrb.mxu2 %v686_v23 }
  0x3e   : > { %1365 = vmatmul.msk.f32.gmra.mxu1 %vm593_vm0, %v584_v12 }
  0x42   : > { %1367 = vmatmul.msk.f32.gmra.mxu2 %vm593_vm0, %v584_v12 }
  0xb3   : > { %v649_v13 = vpop.f32.mrf.mxu1 }
  0xb4   : > { %v650_v25 = vadd.f32 %v1483_v17, %v649_v13 }
  0xb6   : > { %v614_v20 = vpop.f32.mrf.mxu0 }
  0xb7   : > { %v615_v24 = vadd.f32 %v1484_v18, %v614_v20 }
  0xb9   : > { %v617_v26 = vmul.f32 0.35355338, %v615_v24 }
  0xbb   : > { %v652_v19 = vpop.f32.mrf.mxu1 }
  0xbc   : > { %v653_v21 = vadd.f32 %v1483_v17, %v652_v19 }
  0xbd   : > { %v680_v42 = vpop.f32.mrf.mxu2 }
  0xbe   : > { %1021 = vrot.lane.b32.xlu2 %v653_v21, %s1711_s5  ;;  %776 = vrot.lane.b32.xlu1 %v653_v21, %s1712_s3  ;;  %v1937_v43 = vadd.f32 %v1485_v41, %v680_v42 }
  0xbf   : > { %1368 = vmatpush.xpose.msk.msra.mxu3 %vm690_vm1, %v653_v21 }
  0xc3   : > { %1369 = vmatpush.xpose.msk.msra.mxu3 %vm690_vm1, %v650_v25 }
  0xc5   : > { %v683_v44 = vpop.f32.mrf.mxu2 }
  0xc6   : > { %1370 = vmatmul.msk.f32.vlgmr.msra.gmra.mxu3 %vm690_vm1, %v617_v26  ;;  %774 = vrot.lane.b32.xlu1 %v650_v25, %s1712_s3  ;;  %v684_v45 = vadd.f32 %v1485_v41, %v683_v44 }
  0xc7   : > { %772 = vrot.lane.b32.xlu2 %v617_v26, %s1712_s3 }
  0xc8   : > { %1371 = vmatpush.msk.msrb.mxu0 %vm748_vm3, %v684_v45 }
  0xca   : > { %767 = vmatpush.msrb.mxu0 %v1937_v43 }
  0xce   : > { %1019 = vrot.lane.b32.xlu1 %v650_v25, %s1711_s5 }
  0xcf   : > { %1017 = vrot.lane.b32.xlu2 %v617_v26, %s1711_s5 }
  0xd6   : > { %908 = vrot.lane.b32.xlu1 %v650_v25, %s1713_s13 }
  0xd7   : > { %906 = vrot.lane.b32.xlu2 %v617_v26, %s1713_s13 }
 0x118   : > { %v1022_v27 = vpop.permute.xlu2 %1021 }
 0x119   : > { %1386 = vmatpush.xpose.msk.msra.mxu2 %vm690_vm1, %v1022_v27 }
 0x121   : > { %v773_v30 = vpop.permute.xlu2 %772 }
 0x129   : > { %v1018_v55 = vpop.permute.xlu2 %1017 }
 0x130   : > { %v777_v28 = vpop.permute.xlu1 %776 }
 0x131   : > { %1373 = vmatpush.xpose.msk.msrb.mxu3 %vm690_vm1, %v777_v28  ;;  %v907_v61 = vpop.permute.xlu2 %906 }
 0x138   : > { %v775_v29 = vpop.permute.xlu1 %774 }
 0x139   : > { %1374 = vmatpush.xpose.msk.msrb.mxu3 %vm690_vm1, %v775_v29 }
 0x13c   : > { %1375 = vmatmul.msk.f32.vlgmr.msrb.gmra.mxu3 %vm690_vm1, %v773_v30 }
 0x140   : > { %v1020_v31 = vpop.permute.xlu1 %1019 }
 0x141   : > { %1387 = vmatpush.xpose.msk.msra.mxu2 %vm690_vm1, %v1020_v31 }
 0x148   : > { %v909_v60 = vpop.permute.xlu1 %908 }
 0x149   : > { %v717_v32 = vpop.f32.mrf.mxu3 }
 0x14a   : > { %v721_v33 = vsel %vm720_vm2, %v717_v32, -inf }
 0x14b   : > { %722 = vmax.xlane.f32.xlu0 %v721_v33 }
 0x1be   : > { %v723_v34 = vpop.xlane.xlu0 %722 }
 0x1bf   : > { %v724_v35 = vsub.f32 %v717_v32, %v723_v34  ;;  %v801_v36 = vpop.f32.mrf.mxu3 }
 0x1c0   : > { %v804_v37 = vsel %vm720_vm2, %v801_v36, -inf }
 0x1c1   : > { %v725_v38 = vmul.f32 1.442695, %v724_v35  ;;  %805 = vmax.xlane.f32.xlu1 %v804_v37 }
 0x1c3   : > { %1489 = vpow2.f32 %v725_v38 }
 0x1c9   : > { %v1490_v39 = vpop.eup %1489 }
 0x1ca   : > { %v727_v40 = vsel %vm720_vm2, %v1490_v39, 0.0 }
 0x1cb   : > { %728 = vadd.xlane.f32.xlu0 %v727_v40 }
 0x1da   : > { %829 = vrot.lane.b32.xlu1 %v1937_v43, %s1712_s3 }
 0x1df   : > { %910 = vrot.lane.b32.xlu0 %v653_v21, %s1713_s13 }
 0x234   : > { %v806_v1 = vpop.xlane.xlu1 %805 }
 0x235   : > { %v807_v4 = vsub.f32 %v801_v36, %v806_v1 }
 0x237   : > { %v808_v7 = vmul.f32 1.442695, %v807_v4  ;;  %v689_v4 = vld [vmem:[#allocation8 + $0x18] sm:$0xff] }
 0x23e   : > { %v729_v46 = vpop.xlane.xlu0 %728 }
 0x23f   : > { %1491 = vrcp.f32 %v729_v46  ;;  %v741_v50 = vand.u32 2147483648, %v729_v46  ;;  %v739_v52 = vand.u32 2147483647, %v729_v46  ;;  %vm735_vm5 = vweird.f32 %v729_v46 }
 0x241   : > { %v742_v54 = vor.u32 1.1754944e-38, %v741_v50  ;;  %vm740_vm7 = vcmp.eq.f32.partialorder %v739_v52, 8.507059e+37  ;;  %v687_v52 = vld [vmem:[#allocation8 + $0x8] sm:$0xff] }
 0x242   : > { %877 = vmatpush.msrb.mxu1 %v687_v52 }
 0x245   : > { %v1492_v47 = vpop.eup %1491 }
 0x246   : > { %v731_v48 = vmul.f32 %v1492_v47, %v729_v46  ;;  %vm736_vm4 = vweird.f32 %v1492_v47 }
 0x247   : > { %vm737_vm6 = vmor %vm735_vm5, %vm736_vm4 }
 0x248   : > { %v732_v49 = vsub.f32 1.0, %v731_v48 }
 0x24a   : > { %v733_v51 = vmul.f32 %v1492_v47, %v732_v49 }
 0x24c   : > { %v734_v53 = vadd.f32 %v1492_v47, %v733_v51  ;;  %v830_v29 = vpop.permute.xlu1 %829 }
 0x24e   : > { %v738_v56 = vsel %vm737_vm6, %v1492_v47, %v734_v53  ;;  %v688_v53 = vld [vmem:[#allocation8 + $0x10] sm:$0xff] }
 0x24f   : > { %v743_v57 = vsel %vm740_vm7, %v742_v54, %v738_v56  ;;  %1010 = vmatpush.msra.mxu1 %v688_v53 }
 0x250   : > { %v1943_v58 = vmul.f32 %v1490_v39, %v743_v57 }
 0x251   : > { %v911_v59 = vpop.permute.xlu0 %910 }
 0x252   : > { %1372 = vmatmul.msk.f32.vlgmr.msrb.gmra.mxu0 %vm720_vm2, %v1943_v58  ;;  %1380 = vmatpush.xpose.msk.msra.mxu3 %vm690_vm1, %v911_v59 }
 0x256   : > { %1381 = vmatpush.xpose.msk.msra.mxu3 %vm690_vm1, %v909_v60 }
 0x259   : > { %1382 = vmatmul.msk.f32.vlgmr.msra.gmra.mxu3 %vm690_vm1, %v907_v61 }
 0x2cf   : > { %v769_v62 = vpop.f32.mrf.mxu0 }
 0x2d0   : > { %1379 = vmatmul.msk.f32.vlgmr.msrb.gmra.mxu2 %vm690_vm1, %v769_v62 }
 0x2d8   : > { %1388 = vmatmul.msk.f32.vlgmr.msra.gmra.mxu2 %vm690_vm1, %v1018_v55 }
 0x2dc   : > { %v935_v63 = vpop.f32.mrf.mxu3 }
 0x2dd   : > { %v938_v0 = vsel %vm720_vm2, %v935_v63, -inf }
 0x2de   : > { %939 = vmax.xlane.f32.xlu0 %v938_v0 }
 0x351   : > { %v940_v2 = vpop.xlane.xlu0 %939 }
 0x352   : > { %v941_v3 = vsub.f32 %v935_v63, %v940_v2 }
 0x353   : > { %v1953_v5 = vpop.f32.mrf.mxu2 }
 0x354   : > { %v942_v6 = vmul.f32 1.442695, %v941_v3 }
 0x356   : > { %1493 = vpow2.f32 %v942_v6 }
 0x357   : > { %1495 = vpow2.f32 %v808_v7 }
 0x35b   : > { %v1046_v9 = vpop.f32.mrf.mxu2 }
 0x35c   : > { %v1955_v10 = vpop.eup %1493  ;;  %v1049_v11 = vsel %vm720_vm2, %v1046_v9, -inf }
 0x35d   : > { %1050 = vmax.xlane.f32.xlu2 %v1049_v11  ;;  %v944_v12 = vsel %vm720_vm2, %v1955_v10, 0.0  ;;  %v1496_v13 = vpop.eup %1495 }
 0x35e   : > { %945 = vadd.xlane.f32.xlu0 %v944_v12  ;;  %v810_v14 = vsel %vm720_vm2, %v1496_v13, 0.0 }
 0x365   : > { %811 = vadd.xlane.f32.xlu2 %v810_v14 }
 0x372   : > { %1075 = vrot.lane.b32.xlu0 %v684_v45, %s1711_s5 }
 0x37a   : > { %964 = vrot.lane.b32.xlu0 %v684_v45, %s1713_s13 }
 0x37d   : > { %831 = vrot.lane.b32.xlu2 %v684_v45, %s1712_s3  ;;  %s1643_s3 = sshra.s32 %s1197_s19, 4  ;;  %s1644_s3 = int_to_ptr.hbm [resolvable:$true] %s1643_s3 }
 0x37e   : > { %p1650_p3 = scmp.lt.s32.totalorder %s1644_s3, %s2060_s14 }
 0x385   : > { %1073 = vrot.lane.b32.xlu2 %v1937_v43, %s1711_s5  ;;  %s1179_s5 = scalar_lea.sflag [#allocation4], %s558_s22 }
 0x3d0   : > { %v1051_v15 = vpop.xlane.xlu2 %1050 }
 0x3d1   : > { %v1052_v16 = vsub.f32 %v1046_v9, %v1051_v15  ;;  %v946_v17 = vpop.xlane.xlu0 %945 }
 0x3d2   : > { %1497 = vrcp.f32 %v946_v17  ;;  %vm952_vm9 = vweird.f32 %v946_v17  ;;  %v958_v32 = vand.u32 2147483648, %v946_v17  ;;  %v956_v34 = vand.u32 2147483647, %v946_v17 }
 0x3d3   : > { %v1053_v18 = vmul.f32 1.442695, %v1052_v16  ;;  %v1486_v16 = vld [vmem:[%s2056_s10] ss:$0 sm:$0xff] }
 0x3d4   : > { %v959_v40 = vor.u32 1.1754944e-38, %v958_v32  ;;  %vm957_vm14 = vcmp.eq.f32.partialorder %v956_v34, 8.507059e+37 }
 0x3d5   : > { %1499 = vpow2.f32 %v1053_v18 }
 0x3d8   : > { %v1498_v19 = vpop.eup %1497  ;;  %v812_v20 = vpop.xlane.xlu2 %811 }
 0x3d9   : > { %v948_v21 = vmul.f32 %v1498_v19, %v946_v17  ;;  %1501 = vrcp.f32 %v812_v20  ;;  %vm953_vm8 = vweird.f32 %v1498_v19  ;;  %v824_v33 = vand.u32 2147483648, %v812_v20 }
 0x3da   : > { %v822_v36 = vand.u32 2147483647, %v812_v20  ;;  %vm954_vm11 = vmor %vm952_vm9, %vm953_vm8  ;;  %vm818_vm12 = vweird.f32 %v812_v20 }
 0x3db   : > { %v1966_v22 = vpop.eup %1499  ;;  %v949_v23 = vsub.f32 1.0, %v948_v21  ;;  %v825_v41 = vor.u32 1.1754944e-38, %v824_v33 }
 0x3dc   : > { %v1055_v24 = vsel %vm720_vm2, %v1966_v22, 0.0  ;;  %vm823_vm15 = vcmp.eq.f32.partialorder %v822_v36, 8.507059e+37 }
 0x3dd   : > { %1056 = vadd.xlane.f32.xlu1 %v1055_v24  ;;  %v950_v25 = vmul.f32 %v1498_v19, %v949_v23 }
 0x3df   : > { %v1502_v26 = vpop.eup %1501  ;;  %v951_v30 = vadd.f32 %v1498_v19, %v950_v25 }
 0x3e0   : > { %v814_v27 = vmul.f32 %v1502_v26, %v812_v20  ;;  %v832_v28 = vpop.permute.xlu2 %831  ;;  %vm819_vm10 = vweird.f32 %v1502_v26  ;;  %v1714_v20 = vmov 32.0  }
 0x3e1   : > { %1376 = vmatpush.msk.msra.mxu0 %vm748_vm3, %v832_v28  ;;  %v955_v38 = vsel %vm954_vm11, %v1498_v19, %v951_v30  ;;  %vm820_vm13 = vmor %vm818_vm12, %vm819_vm10 }
 0x3e2   : > { %v815_v31 = vsub.f32 1.0, %v814_v27  ;;  %v960_v45 = vsel %vm957_vm14, %v959_v40, %v955_v38 }
 0x3e3   : > { %854 = vmatpush.msra.mxu0 %v830_v29  ;;  %v961_v50 = vmul.f32 %v1955_v10, %v960_v45 }
 0x3e4   : > { %v816_v35 = vmul.f32 %v1502_v26, %v815_v31  ;;  %v1076_v37 = vpop.permute.xlu0 %1075 }
 0x3e5   : > { %1389 = vmatpush.msk.msrb.mxu3 %vm748_vm3, %v1076_v37 }
 0x3e6   : > { %v817_v39 = vadd.f32 %v1502_v26, %v816_v35 }
 0x3e8   : > { %v821_v42 = vsel %vm820_vm13, %v1502_v26, %v817_v39  ;;  %v1074_v44 = vpop.permute.xlu2 %1073 }
 0x3e9   : > { %v826_v46 = vsel %vm823_vm15, %v825_v41, %v821_v42  ;;  %1098 = vmatpush.msrb.mxu3 %v1074_v44 }
 0x3ea   : > { %v827_v47 = vmul.f32 %v1496_v13, %v826_v46 }
 0x3ec   : > { %1377 = vmatmul.msk.f32.vlgmr.msra.gmra.mxu0 %vm720_vm2, %v827_v47  ;;  %v905_v48 = vadd.f32 %v827_v47, %v1943_v58  ;;  %v965_v49 = vpop.permute.xlu0 %964 }
 0x3ed   : > { %1383 = vmatpush.msk.msrb.mxu0 %vm748_vm3, %v965_v49 }
 0x3ee   : > { %v1016_v51 = vadd.f32 %v961_v50, %v905_v48 }
 0x3f6   : > { %962 = vrot.lane.b32.xlu1 %v1937_v43, %s1713_s13  ;;  %s1645_s13 = scalar_lea.hbm %s1644_s3, 8 }
 0x3f7   : > { %p1646_p0 = scmp.ne.s32.totalorder %s1644_s3, %s1645_s13  ;;  %p1651_p4 = scmp.lt.s32.totalorder %s1649_s16, %s1645_s13 }
 0x3f9   : > { %p1647_p1 = pnand %p1646_p0, %p1828_p5  ;;  %p1652_p7 = por %p1651_p4, %p1650_p3 }
 0x3fb   : > { %p1648_p2 = pneg %p1647_p1 }
 0x3fd   : > { %p1653_p8 = pnand %p1652_p7, %p1648_p2 }
 0x450   : > { %v1057_v54 = vpop.xlane.xlu1 %1056 }
 0x451   : > { %1503 = vrcp.f32 %v1057_v54  ;;  %v1069_v58 = vand.u32 2147483648, %v1057_v54  ;;  %v1067_v60 = vand.u32 2147483647, %v1057_v54  ;;  %vm1063_vm3 = vweird.f32 %v1057_v54 }
 0x452   : > { %1505 = vrcp.f32 %v1714_v20 }
 0x453   : > { %v1070_v62 = vor.u32 1.1754944e-38, %v1069_v58  ;;  %vm1068_vm6 = vcmp.eq.f32.partialorder %v1067_v60, 8.507059e+37 }
 0x457   : > { %v1504_v55 = vpop.eup %1503 }
 0x458   : > { %v1059_v56 = vmul.f32 %v1504_v55, %v1057_v54  ;;  %vm1064_vm4 = vweird.f32 %v1504_v55  ;;  %v1506_v21 = vpop.eup %1505 }
 0x459   : > { %vm1065_vm5 = vmor %vm1063_vm3, %vm1064_vm4 }
 0x45a   : > { %v1060_v57 = vsub.f32 1.0, %v1059_v56 }
 0x45c   : > { %v1061_v59 = vmul.f32 %v1504_v55, %v1060_v57 }
 0x45e   : > { %v1062_v61 = vadd.f32 %v1504_v55, %v1061_v59 }
 0x460   : > { %v1066_v43 = vsel %vm1065_vm5, %v1504_v55, %v1062_v61 }
 0x461   : > { %v1071_v63 = vsel %vm1068_vm6, %v1070_v62, %v1066_v43 }
 0x462   : > { %v1072_v0 = vmul.f32 %v1966_v22, %v1071_v63 }
 0x464   : > { %1390 = vmatmul.msk.f32.vlgmr.msrb.gmra.mxu3 %vm720_vm2, %v1072_v0  ;;  %v1127_v1 = vadd.f32 %v1072_v0, %v1016_v51 }
 0x466   : > { %v1172_v2 = vmul.f32 0.25, %v1127_v1 }
 0x468   : > { %v963_v3 = vpop.permute.xlu1 %962  ;;  %1173 = vst.msk [vmem:[%s560_s25] sm:$0xff] %vm720_vm2, %v1172_v2 }
 0x469   : > { %v856_v6 = vpop.f32.mrf.mxu0  ;;  %987 = vmatpush.msrb.mxu0 %v963_v3 }
 0x46a   : > { %1378 = vmatmul.msk.f32.vlgmr.msrb.gmra.mxu1 %vm690_vm1, %v856_v6  ;;  %1384 = vmatmul.msk.f32.vlgmr.msrb.gmra.mxu0 %vm720_vm2, %v961_v50 }
 0x46b   : > { %1121 = vmatpush.msra.mxu0 %v689_v4 }
 0x4e7   : > { %v989_v7 = vpop.f32.mrf.mxu0  ;;  %v1100_v9 = vpop.f32.mrf.mxu3 }
 0x4e8   : > { %1385 = vmatmul.msk.f32.vlgmr.msra.gmra.mxu1 %vm690_vm1, %v989_v7  ;;  %1391 = vmatmul.msk.f32.vlgmr.msra.gmra.mxu0 %vm690_vm1, %v1100_v9  ;;  %v879_v10 = vpop.f32.mrf.mxu1  ;;  %vm1142_vm1 = vweird.f32 %v1506_v21 }
 0x4e9   : > { %v903_v11 = vadd.f32 %v1953_v5, %v879_v10  ;;  %v1138_v5 = vmul.f32 32.0, %v1506_v21 }
 0x4eb   : > { %v1139_v22 = vsub.f32 1.0, %v1138_v5 }
 0x4ed   : > { %v1140_v23 = vmul.f32 %v1506_v21, %v1139_v22 }
 0x4ef   : > { %v1141_v24 = vadd.f32 %v1506_v21, %v1140_v23 }
 0x4f1   : > { %v1143_v25 = vsel %vm1142_vm1, %v1506_v21, %v1141_v24 }
 0x565   : > { %v1012_v12 = vpop.f32.mrf.mxu1  ;;  %v1123_v14 = vpop.f32.mrf.mxu0 }
 0x566   : > { %v1015_v13 = vadd.f32 %v1012_v12, %v903_v11 }
 0x568   : > { %v1126_v15 = vadd.f32 %v1123_v14, %v1015_v13 }
 0x56a   : > { %v1128_v17 = vadd.f32 %v1126_v15, %v1900_v8 }
 0x56c   : > { %v1133_v18 = vadd.f32 %v1486_v16, %v1128_v17 }
 0x56e   : > { %v1134_v19 = vsel %vm593_vm0, %v1133_v18, 0.0 }
 0x56f   : > { %1135 = vadd.xlane.f32.xlu2 %v1134_v19 }
 0x5e2   : > { %v1136_v26 = vpop.xlane.xlu2 %1135 }
 0x5e3   : > { %v1144_v27 = vmul.f32 %v1143_v25, %v1136_v26 }
 0x5e5   : > { %v1145_v8 = vsub.f32 %v1133_v18, %v1144_v27 }
 0x5e7   : > { %v1146_v28 = vmul.f32 %v1145_v8, %v1145_v8 }
 0x5e9   : > { %v1147_v29 = vsel %vm593_vm0, %v1146_v28, 0.0 }
 0x5ea   : > { %1148 = vadd.xlane.f32.xlu0 %v1147_v29 }
 0x5eb   : > { %1656 = shalt.err (!%p1653_p8)
}
 0x5ec   : > { %1413 = dma.vmem_to_hbm [thread:$0]  (%p1828_p5), %s1195_s15, 128, %s1197_s19, %s1179_s5   ;;  %v1487_v39 = vld [vmem:[%s2057_s11] ss:$0 sm:$0xff] }
 0x5ed   : > { %s2083_s26 = sld [smem:[#allocation23_spill]] }
 0x5ee   : > { %s2084_s20 = sld [smem:[#allocation24_spill]] }
 0x5f3   : > { %v1488_v41 = vld [vmem:[%s2083_s26] ss:$0 sm:$0xff] }
 0x5f4   : > { %s577_s15 = scalar_lea.vmem %s2084_s20, %s1887_s12 }
 0x65d   : > { %v1149_v30 = vpop.xlane.xlu0 %1148 }
 0x65e   : > { %v1150_v31 = vmul.f32 %v1149_v30, %v1143_v25 }
 0x660   : > { %v1151_v32 = vadd.f32 1e-05, %v1150_v31 }
 0x662   : > { %1507 = vrsqrt.f32 %v1151_v32  ;;  %vm1158_vm7 = vweird.f32 %v1151_v32 }
 0x668   : > { %v1508_v33 = vpop.eup %1507 }
 0x669   : > { %v1153_v34 = vmul.f32 %v1508_v33, %v1151_v32  ;;  %vm1159_vm2 = vweird.f32 %v1508_v33 }
 0x66a   : > { %vm1160_vm8 = vmor %vm1158_vm7, %vm1159_vm2 }
 0x66b   : > { %v1154_v35 = vmul.f32 %v1508_v33, %v1153_v34 }
 0x66d   : > { %v1155_v36 = vmul.f32 0.5, %v1154_v35 }
 0x66f   : > { %v1156_v37 = vsub.f32 1.5, %v1155_v36 }
 0x671   : > { %v1157_v38 = vmul.f32 %v1508_v33, %v1156_v37 }
 0x673   : > { %v1161_v40 = vsel %vm1160_vm8, %v1508_v33, %v1157_v38 }
 0x674   : > { %v1162_v42 = vmul.f32 %v1161_v40, %v1145_v8 }
 0x676   : > { %v1166_v44 = vmul.f32 %v1487_v39, %v1162_v42 }
 0x678   : > { %v1170_v45 = vadd.f32 %v1488_v41, %v1166_v44 }
 0x67a   : > { %1171 = vst.msk [vmem:[%s577_s15] sm:$0xff] %vm593_vm0, %v1170_v45 }
 0x67b PF: > { %s2085_s19 = sld [smem:[#allocation17_spill]] }
 0x67c   : > { %s2086_s5 = sld [smem:[#allocation15_spill]] }
 0x681   : > { %p1440_p5 = scmp.ge.s32.totalorder %s2085_s19, 2 }
 0x682   : > { %s1215_s13 = sand.u32 1, %s2086_s5  }
 0x683   : > { %p1429_p9 = pnand %p1440_p5, %p1832_p6  ;;  %s1216_s29 = scalar_lea.sflag [#allocation4], %s1215_s13 }
 0x685   : > { %p1430_p10 = pneg %p1429_p9 }
 0x687   : > { %1686 = dma.done.wait (%p1430_p10), %s1216_s29, 128  }
 0x688   : > { %1688 = vsyncadd (%p1430_p10), %s1216_s29, 4294967168  ;;  %s2088_s16 = sld [smem:[#allocation18_spill]]  ;;  %s2091_s29 = smov %s1695_s30 }
 0x689   : > { %s2089_s17 = sld [smem:[#allocation16_spill]] }
 0x68a   : > { %s2090_s15 = sld [smem:[#allocation19_spill]] }
 0x68e   : > { %p28_p11 = scmp.ge.s32.totalorder %s2088_s16, 4  }
 0x68f   : > { %s2092_s30 = smov %s2089_s17 }
 0x690   :  { %30 = sbr.rel (!%p28_p11) target bundleno = 11 (0xb), region = 142 }
 0x695   :  { %1222 = vsyncpa [#allocation3], 1 }
 0x696   :  { %1224 = vsyncpa [#allocation3 + $0x1], 1 }
 0x697   :  { %1225 = vsyncpa [#allocation6], 1 }
 0x698   :  { %1226 = vsyncpa [#allocation9], 1 }
 0x699   :  { %1227 = vsyncpa [#allocation4], 1 }
 0x69a   :  { %1229 = vsyncpa [#allocation4 + $0x1], 1 }

</bundles_post_ra>
